<compile_context>
chip_gen: v7x
topology: tpu7x:2x2x1
jax: 0.10.0
libtpu: 0.0.40
codegen_flags: <defaults>
</compile_context>

<pallas_src>
import functools
import math

import jax
import jax.numpy as jnp
from jax.experimental import pallas as pl
from jax.experimental.pallas import tpu as pltpu


def _round_up(x, m):
    return ((x + m - 1) // m) * m


def _qlstm_recurrent_kernel(pre_ref, h0_ref, c0_ref, whh_ref,
                            out_ref, hN_ref, cN_ref,
                            *, time_chunk, seq_len, hidden_pad, needs_mask):
    """Recurrent half of a single-layer QLSTM.

    pre_ref : (TC, Bp, 4*Hp)  precomputed  x_t @ W_ih^T + (b_ih + b_hh)
    h0/c0   : (Bp, Hp)        initial state
    whh_ref : (Hp, 4*Hp)      recurrent weights (transposed, gate-padded)
    out_ref : (TC, Bp, Hp)    per-step hidden outputs for this chunk
    hN/cN   : (Bp, Hp)        live recurrent state (constant-index outputs,
                              resident in VMEM across the whole grid)
    """
    s = pl.program_id(0)
    Hp = hidden_pad

    # Load the initial state into the resident output refs on the first chunk.
    @pl.when(s == 0)
    def _():
        hN_ref[...] = h0_ref[...]
        cN_ref[...] = c0_ref[...]

    whh = whh_ref[...]  # (Hp, 4*Hp)

    def step(lt, carry):
        h, c = carry
        # One MXU push per serial step: the recurrent projection only.
        gates = pre_ref[lt] + jnp.dot(h, whh,
                                      preferred_element_type=jnp.float32)
        # Each gate slab is 128-lane aligned (gate k lives at [k*Hp, (k+1)*Hp)).
        i_g = jax.nn.sigmoid(gates[:, 0 * Hp:1 * Hp])
        f_g = jax.nn.sigmoid(gates[:, 1 * Hp:2 * Hp])
        g_g = jnp.tanh(gates[:, 2 * Hp:3 * Hp])
        o_g = jax.nn.sigmoid(gates[:, 3 * Hp:4 * Hp])

        c_new = f_g * c + i_g * g_g
        h_new = o_g * jnp.tanh(c_new)

        if needs_mask:  # static: only emitted when T % TC != 0
            valid = (s * time_chunk + lt) < seq_len
            h_new = jnp.where(valid, h_new, h)
            c_new = jnp.where(valid, c_new, c)

        out_ref[lt] = h_new
        return h_new, c_new

    h, c = jax.lax.fori_loop(0, time_chunk, step,
                             (hN_ref[...], cN_ref[...]), unroll=True)
    hN_ref[...] = h
    cN_ref[...] = c


def qlstm_forward(x, hx, w_ih, w_hh, b_ih, b_hh, *, time_chunk=8):
    """Single-layer unidirectional QLSTM forward (FP/32-bit quantization).

    x:    (T, B, I)   time-major input (batch_first=False)
    hx:   (h0, c0), each (1, B, H)
    w_ih: (4H, I), w_hh: (4H, H), b_ih/b_hh: (4H,)   gate order (i, f, g, o)
    Returns (output (T, B, H), (h_n (1,B,H), c_n (1,B,H))) like torch RNNBase.
    """
    T, B, I = x.shape
    H = w_hh.shape[1]
    f32 = jnp.float32

    h0, c0 = hx
    h0 = h0[0].astype(f32)
    c0 = c0[0].astype(f32)

    # ---------------- padded layout ----------------
    Hp = _round_up(H, 128)            # lane-dense gate slabs / output
    Bp = _round_up(B, 8)              # f32 sublane width
    Gp = 4 * Hp
    TC = max(1, min(time_chunk, T))   # timesteps per grid step
    n_chunks = -(-T // TC)
    T_pad = n_chunks * TC
    needs_mask = (T_pad != T)

    # ---------------- parameter plumbing (glue) ----------------
    # Per-gate transpose + pad: gate k's columns live at [k*Hp, k*Hp + H).
    def gate_padded_T(w, rows, rows_pad):
        out = jnp.zeros((rows_pad, Gp), f32)
        for k in range(4):
            out = out.at[:rows, k * Hp:k * Hp + H].set(
                w[k * H:(k + 1) * H, :].astype(f32).T)
        return out

    wih_T = gate_padded_T(w_ih, I, I)        # (I,  Gp)
    whh_T = gate_padded_T(w_hh, H, Hp)       # (Hp, Gp) — padded rows are zero

    bias = (b_ih + b_hh).astype(f32)         # pre-sum both biases once
    b_pad = jnp.zeros((Gp,), f32)
    for k in range(4):
        b_pad = b_pad.at[k * Hp:k * Hp + H].set(bias[k * H:(k + 1) * H])

    # ---------------- hoisted input projection ----------------
    # No recurrent dependence: one big MXU-friendly matmul over all timesteps.
    x_pad = jnp.zeros((T_pad, Bp, I), f32).at[:T, :B, :].set(x.astype(f32))
    pre = x_pad.reshape(T_pad * Bp, I) @ wih_T + b_pad[None, :]
    pre = pre.reshape(T_pad, Bp, Gp)

    h0_pad = jnp.zeros((Bp, Hp), f32).at[:B, :H].set(h0)
    c0_pad = jnp.zeros((Bp, Hp), f32).at[:B, :H].set(c0)

    kernel = functools.partial(
        _qlstm_recurrent_kernel,
        time_chunk=TC, seq_len=T, hidden_pad=Hp, needs_mask=needs_mask)

    grid_spec = pltpu.PrefetchScalarGridSpec(
        num_scalar_prefetch=0,
        grid=(n_chunks,),
        in_specs=[
            pl.BlockSpec((TC, Bp, Gp), lambda s: (s, 0, 0)),   # pre-gates chunk
            pl.BlockSpec((Bp, Hp), lambda s: (0, 0)),          # h0
            pl.BlockSpec((Bp, Hp), lambda s: (0, 0)),          # c0
            pl.BlockSpec((Hp, Gp), lambda s: (0, 0)),          # W_hh^T
        ],
        out_specs=[
            pl.BlockSpec((TC, Bp, Hp), lambda s: (s, 0, 0)),   # per-step h
            pl.BlockSpec((Bp, Hp), lambda s: (0, 0)),          # final h (state)
            pl.BlockSpec((Bp, Hp), lambda s: (0, 0)),          # final c (state)
        ],
    )

    out_pad, hN_pad, cN_pad = pl.pallas_call(
        kernel,
        out_shape=(
            jax.ShapeDtypeStruct((T_pad, Bp, Hp), f32),
            jax.ShapeDtypeStruct((Bp, Hp), f32),
            jax.ShapeDtypeStruct((Bp, Hp), f32),
        ),
        grid_spec=grid_spec,
        compiler_params=pltpu.CompilerParams(
            dimension_semantics=("arbitrary",)),   # time recurrence is serial
    )(pre, h0_pad, c0_pad, whh_T)

    out = out_pad[:T, :B, :H].astype(x.dtype)
    h_n = hN_pad[:B, :H].astype(x.dtype)
    c_n = cN_pad[:B, :H].astype(x.dtype)
    return out, (h_n[None], c_n[None])


def _reference_lstm(x, hx, w_ih, w_hh, b_ih, b_hh):
    """Pure-JAX reference of the same forward (for correctness check)."""
    H = w_hh.shape[1]
    h0, c0 = hx[0][0], hx[1][0]

    def step(carry, x_t):
        h, c = carry
        gates = x_t @ w_ih.T + b_ih + h @ w_hh.T + b_hh
        i = jax.nn.sigmoid(gates[:, 0 * H:1 * H])
        f = jax.nn.sigmoid(gates[:, 1 * H:2 * H])
        g = jnp.tanh(gates[:, 2 * H:3 * H])
        o = jax.nn.sigmoid(gates[:, 3 * H:4 * H])
        c_new = f * c + i * g
        h_new = o * jnp.tanh(c_new)
        return (h_new, c_new), h_new

    (h_n, c_n), out = jax.lax.scan(step, (h0, c0), x)
    return out, (h_n[None], c_n[None])


if __name__ == "__main__":
    # Module config (mode='QLSTM', defaults: num_layers=1, bias=True,
    # batch_first=False, bidirectional=False, all quantization = FP/32-bit).
    input_size, hidden_size = 16, 32
    T, B = 8, 4
    gate_size = 4 * hidden_size

    key = jax.random.PRNGKey(0)
    k_x, k_wih, k_whh, k_bih, k_bhh = jax.random.split(key, 5)

    # reset_parameters(): uniform(-stdv, stdv), stdv = 1/sqrt(hidden_size)
    stdv = 1.0 / math.sqrt(hidden_size)
    w_ih = jax.random.uniform(k_wih, (gate_size, input_size),
                              jnp.float32, -stdv, stdv)
    w_hh = jax.random.uniform(k_whh, (gate_size, hidden_size),
                              jnp.float32, -stdv, stdv)
    b_ih = jax.random.uniform(k_bih, (gate_size,), jnp.float32, -stdv, stdv)
    b_hh = jax.random.uniform(k_bhh, (gate_size,), jnp.float32, -stdv, stdv)

    # Input (T, B, input_size); hx defaults to zeros (QLSTM -> (h0, c0)).
    x = jax.random.normal(k_x, (T, B, input_size), jnp.float32)
    h0 = jnp.zeros((1, B, hidden_size), jnp.float32)
    c0 = jnp.zeros((1, B, hidden_size), jnp.float32)

    out_ref, (h_ref, c_ref) = _reference_lstm(x, (h0, c0), w_ih, w_hh, b_ih, b_hh)

    # Case 1: whole sequence in one grid step (T % TC == 0, no masking path).
    out, (h_n, c_n) = qlstm_forward(x, (h0, c0), w_ih, w_hh, b_ih, b_hh,
                                    time_chunk=8)
    jax.block_until_ready((out, h_n, c_n))
    assert jnp.allclose(out, out_ref, atol=1e-5, rtol=1e-5)
    assert jnp.allclose(h_n, h_ref, atol=1e-5, rtol=1e-5)
    assert jnp.allclose(c_n, c_ref, atol=1e-5, rtol=1e-5)

    # Case 2: chunk size that does not divide T (exercises the tail mask).
    out2, (h_n2, c_n2) = qlstm_forward(x, (h0, c0), w_ih, w_hh, b_ih, b_hh,
                                       time_chunk=3)
    jax.block_until_ready((out2, h_n2, c_n2))
    assert jnp.allclose(out2, out_ref, atol=1e-5, rtol=1e-5)
    assert jnp.allclose(h_n2, h_ref, atol=1e-5, rtol=1e-5)
    assert jnp.allclose(c_n2, c_ref, atol=1e-5, rtol=1e-5)

    print("KERNEL_OK")
</pallas_src>

<mosaic_0001>
module attributes {stable_mosaic.version = 11 : i64} {
  func.func @_qlstm_recurrent_kernel(%arg0: i32, %arg1: memref<8x8x512xf32, #tpu.memory_space<vmem>>, %arg2: memref<8x128xf32, #tpu.memory_space<vmem>>, %arg3: memref<8x128xf32, #tpu.memory_space<vmem>>, %arg4: memref<128x512xf32, #tpu.memory_space<vmem>>, %arg5: memref<8x8x128xf32, #tpu.memory_space<vmem>>, %arg6: memref<8x128xf32, #tpu.memory_space<vmem>>, %arg7: memref<8x128xf32, #tpu.memory_space<vmem>>) attributes {dimension_semantics = [#tpu.dimension_semantics<arbitrary>], iteration_bounds = array<i64: 1>, scalar_prefetch = 0 : i64, scratch_operands = 0 : i64, tpu.core_type = #tpu.core_type<tc>, window_params = [{transform_indices = @transform_0, window_bounds = array<i64: 8, 8, 512>}, {pipeline_mode = #tpu.pipeline_mode<synchronous>, transform_indices = @transform_1, window_bounds = array<i64: 8, 128>}, {pipeline_mode = #tpu.pipeline_mode<synchronous>, transform_indices = @transform_2, window_bounds = array<i64: 8, 128>}, {pipeline_mode = #tpu.pipeline_mode<synchronous>, transform_indices = @transform_3, window_bounds = array<i64: 128, 512>}, {transform_indices = @transform_4, window_bounds = array<i64: 8, 8, 128>}, {pipeline_mode = #tpu.pipeline_mode<synchronous>, transform_indices = @transform_5, window_bounds = array<i64: 8, 128>}, {pipeline_mode = #tpu.pipeline_mode<synchronous>, transform_indices = @transform_6, window_bounds = array<i64: 8, 128>}]} {
    %c0_i32 = arith.constant 0 : i32
    %0 = arith.cmpi eq, %arg0, %c0_i32 : i32
    %1 = arith.extui %0 : i1 to i32
    %c0_i32_0 = arith.constant 0 : i32
    %2 = arith.cmpi ne, %1, %c0_i32_0 : i32
    scf.if %2 {
      %c0_74 = arith.constant 0 : index
      %c0_75 = arith.constant 0 : index
      %280 = vector.load %arg2[%c0_74, %c0_75] : memref<8x128xf32, #tpu.memory_space<vmem>>, vector<8x128xf32>
      %c0_76 = arith.constant 0 : index
      %c0_77 = arith.constant 0 : index
      %281 = vector.load %arg6[%c0_76, %c0_77] : memref<8x128xf32, #tpu.memory_space<vmem>>, vector<8x128xf32>
      tpu.vector_store %arg6[%c0_76, %c0_77], %280 {strides = array<i32>} : memref<8x128xf32, #tpu.memory_space<vmem>>, vector<8x128xf32>,
      %c0_78 = arith.constant 0 : index
      %c0_79 = arith.constant 0 : index
      %282 = vector.load %arg3[%c0_78, %c0_79] : memref<8x128xf32, #tpu.memory_space<vmem>>, vector<8x128xf32>
      %c0_80 = arith.constant 0 : index
      %c0_81 = arith.constant 0 : index
      %283 = vector.load %arg7[%c0_80, %c0_81] : memref<8x128xf32, #tpu.memory_space<vmem>>, vector<8x128xf32>
      tpu.vector_store %arg7[%c0_80, %c0_81], %282 {strides = array<i32>} : memref<8x128xf32, #tpu.memory_space<vmem>>, vector<8x128xf32>,
    } else {
    }
    %c0 = arith.constant 0 : index
    %c0_1 = arith.constant 0 : index
    %3 = vector.load %arg4[%c0, %c0_1] : memref<128x512xf32, #tpu.memory_space<vmem>>, vector<128x512xf32>
    %c0_2 = arith.constant 0 : index
    %c0_3 = arith.constant 0 : index
    %4 = vector.load %arg6[%c0_2, %c0_3] : memref<8x128xf32, #tpu.memory_space<vmem>>, vector<8x128xf32>
    %c0_4 = arith.constant 0 : index
    %c0_5 = arith.constant 0 : index
    %5 = vector.load %arg7[%c0_4, %c0_5] : memref<8x128xf32, #tpu.memory_space<vmem>>, vector<8x128xf32>
    %c0_i32_6 = arith.constant 0 : i32
    %6 = arith.index_cast %c0_i32_6 : i32 to index
    %c0_7 = arith.constant 0 : index
    %c0_8 = arith.constant 0 : index
    %7 = vector.load %arg1[%6, %c0_7, %c0_8] : memref<8x8x512xf32, #tpu.memory_space<vmem>>, vector<1x8x512xf32>
    %8 = vector.shape_cast %7 : vector<1x8x512xf32> to vector<8x512xf32>
    %cst = arith.constant dense<0.000000e+00> : vector<8x512xf32>
    %9 = tpu.matmul %4, %3, %cst {dimension_numbers = #tpu.dot_dimension_numbers<[1], [0], [0], [1], [0, 0, 1, 1], [], []>} : vector<8x128xf32>, vector<128x512xf32>, vector<8x512xf32> -> vector<8x512xf32>
    %10 = arith.addf %8, %9 : vector<8x512xf32>
    %11 = vector.extract_strided_slice %10 {offsets = [0, 0], sizes = [8, 128], strides = [1, 1]} : vector<8x512xf32> to vector<8x128xf32>
    %12 = arith.negf %11 : vector<8x128xf32>
    %13 = math.exp %12 : vector<8x128xf32>
    %cst_9 = arith.constant 1.000000e+00 : f32
    %14 = vector.broadcast %cst_9 : f32 to vector<8x128xf32>
    %15 = arith.addf %14, %13 : vector<8x128xf32>
    %16 = arith.divf %14, %15 : vector<8x128xf32>
    %17 = vector.extract_strided_slice %10 {offsets = [0, 128], sizes = [8, 128], strides = [1, 1]} : vector<8x512xf32> to vector<8x128xf32>
    %18 = arith.negf %17 : vector<8x128xf32>
    %19 = math.exp %18 : vector<8x128xf32>
    %cst_10 = arith.constant 1.000000e+00 : f32
    %20 = vector.broadcast %cst_10 : f32 to vector<8x128xf32>
    %21 = arith.addf %20, %19 : vector<8x128xf32>
    %22 = arith.divf %20, %21 : vector<8x128xf32>
    %23 = vector.extract_strided_slice %10 {offsets = [0, 256], sizes = [8, 128], strides = [1, 1]} : vector<8x512xf32> to vector<8x128xf32>
    %24 = math.tanh %23 : vector<8x128xf32>
    %25 = vector.extract_strided_slice %10 {offsets = [0, 384], sizes = [8, 128], strides = [1, 1]} : vector<8x512xf32> to vector<8x128xf32>
    %26 = arith.negf %25 : vector<8x128xf32>
    %27 = math.exp %26 : vector<8x128xf32>
    %cst_11 = arith.constant 1.000000e+00 : f32
    %28 = vector.broadcast %cst_11 : f32 to vector<8x128xf32>
    %29 = arith.addf %28, %27 : vector<8x128xf32>
    %30 = arith.divf %28, %29 : vector<8x128xf32>
    %31 = arith.mulf %22, %5 : vector<8x128xf32>
    %32 = arith.mulf %16, %24 : vector<8x128xf32>
    %33 = arith.addf %31, %32 : vector<8x128xf32>
    %34 = math.tanh %33 : vector<8x128xf32>
    %35 = arith.mulf %30, %34 : vector<8x128xf32>
    %36 = arith.index_cast %c0_i32_6 : i32 to index
    %c0_12 = arith.constant 0 : index
    %c0_13 = arith.constant 0 : index
    %37 = vector.load %arg5[%36, %c0_12, %c0_13] : memref<8x8x128xf32, #tpu.memory_space<vmem>>, vector<1x8x128xf32>
    %38 = vector.shape_cast %37 : vector<1x8x128xf32> to vector<8x128xf32>
    %39 = vector.shape_cast %35 : vector<8x128xf32> to vector<1x8x128xf32>
    tpu.vector_store %arg5[%36, %c0_12, %c0_13], %39 {strides = array<i32>} : memref<8x8x128xf32, #tpu.memory_space<vmem>>, vector<1x8x128xf32>,
    %c1_i32 = arith.constant 1 : i32
    %40 = arith.index_cast %c1_i32 : i32 to index
    %c0_14 = arith.constant 0 : index
    %c0_15 = arith.constant 0 : index
    %41 = vector.load %arg1[%40, %c0_14, %c0_15] : memref<8x8x512xf32, #tpu.memory_space<vmem>>, vector<1x8x512xf32>
    %42 = vector.shape_cast %41 : vector<1x8x512xf32> to vector<8x512xf32>
    %cst_16 = arith.constant dense<0.000000e+00> : vector<8x512xf32>
    %43 = tpu.matmul %35, %3, %cst_16 {dimension_numbers = #tpu.dot_dimension_numbers<[1], [0], [0], [1], [0, 0, 1, 1], [], []>} : vector<8x128xf32>, vector<128x512xf32>, vector<8x512xf32> -> vector<8x512xf32>
    %44 = arith.addf %42, %43 : vector<8x512xf32>
    %45 = vector.extract_strided_slice %44 {offsets = [0, 0], sizes = [8, 128], strides = [1, 1]} : vector<8x512xf32> to vector<8x128xf32>
    %46 = arith.negf %45 : vector<8x128xf32>
    %47 = math.exp %46 : vector<8x128xf32>
    %cst_17 = arith.constant 1.000000e+00 : f32
    %48 = vector.broadcast %cst_17 : f32 to vector<8x128xf32>
    %49 = arith.addf %48, %47 : vector<8x128xf32>
    %50 = arith.divf %48, %49 : vector<8x128xf32>
    %51 = vector.extract_strided_slice %44 {offsets = [0, 128], sizes = [8, 128], strides = [1, 1]} : vector<8x512xf32> to vector<8x128xf32>
    %52 = arith.negf %51 : vector<8x128xf32>
    %53 = math.exp %52 : vector<8x128xf32>
    %cst_18 = arith.constant 1.000000e+00 : f32
    %54 = vector.broadcast %cst_18 : f32 to vector<8x128xf32>
    %55 = arith.addf %54, %53 : vector<8x128xf32>
    %56 = arith.divf %54, %55 : vector<8x128xf32>
    %57 = vector.extract_strided_slice %44 {offsets = [0, 256], sizes = [8, 128], strides = [1, 1]} : vector<8x512xf32> to vector<8x128xf32>
    %58 = math.tanh %57 : vector<8x128xf32>
    %59 = vector.extract_strided_slice %44 {offsets = [0, 384], sizes = [8, 128], strides = [1, 1]} : vector<8x512xf32> to vector<8x128xf32>
    %60 = arith.negf %59 : vector<8x128xf32>
    %61 = math.exp %60 : vector<8x128xf32>
    %cst_19 = arith.constant 1.000000e+00 : f32
    %62 = vector.broadcast %cst_19 : f32 to vector<8x128xf32>
    %63 = arith.addf %62, %61 : vector<8x128xf32>
    %64 = arith.divf %62, %63 : vector<8x128xf32>
    %65 = arith.mulf %56, %33 : vector<8x128xf32>
    %66 = arith.mulf %50, %58 : vector<8x128xf32>
    %67 = arith.addf %65, %66 : vector<8x128xf32>
    %68 = math.tanh %67 : vector<8x128xf32>
    %69 = arith.mulf %64, %68 : vector<8x128xf32>
    %70 = arith.index_cast %c1_i32 : i32 to index
    %c0_20 = arith.constant 0 : index
    %c0_21 = arith.constant 0 : index
    %71 = vector.load %arg5[%70, %c0_20, %c0_21] : memref<8x8x128xf32, #tpu.memory_space<vmem>>, vector<1x8x128xf32>
    %72 = vector.shape_cast %71 : vector<1x8x128xf32> to vector<8x128xf32>
    %73 = vector.shape_cast %69 : vector<8x128xf32> to vector<1x8x128xf32>
    tpu.vector_store %arg5[%70, %c0_20, %c0_21], %73 {strides = array<i32>} : memref<8x8x128xf32, #tpu.memory_space<vmem>>, vector<1x8x128xf32>,
    %c2_i32 = arith.constant 2 : i32
    %74 = arith.index_cast %c2_i32 : i32 to index
    %c0_22 = arith.constant 0 : index
    %c0_23 = arith.constant 0 : index
    %75 = vector.load %arg1[%74, %c0_22, %c0_23] : memref<8x8x512xf32, #tpu.memory_space<vmem>>, vector<1x8x512xf32>
    %76 = vector.shape_cast %75 : vector<1x8x512xf32> to vector<8x512xf32>
    %cst_24 = arith.constant dense<0.000000e+00> : vector<8x512xf32>
    %77 = tpu.matmul %69, %3, %cst_24 {dimension_numbers = #tpu.dot_dimension_numbers<[1], [0], [0], [1], [0, 0, 1, 1], [], []>} : vector<8x128xf32>, vector<128x512xf32>, vector<8x512xf32> -> vector<8x512xf32>
    %78 = arith.addf %76, %77 : vector<8x512xf32>
    %79 = vector.extract_strided_slice %78 {offsets = [0, 0], sizes = [8, 128], strides = [1, 1]} : vector<8x512xf32> to vector<8x128xf32>
    %80 = arith.negf %79 : vector<8x128xf32>
    %81 = math.exp %80 : vector<8x128xf32>
    %cst_25 = arith.constant 1.000000e+00 : f32
    %82 = vector.broadcast %cst_25 : f32 to vector<8x128xf32>
    %83 = arith.addf %82, %81 : vector<8x128xf32>
    %84 = arith.divf %82, %83 : vector<8x128xf32>
    %85 = vector.extract_strided_slice %78 {offsets = [0, 128], sizes = [8, 128], strides = [1, 1]} : vector<8x512xf32> to vector<8x128xf32>
    %86 = arith.negf %85 : vector<8x128xf32>
    %87 = math.exp %86 : vector<8x128xf32>
    %cst_26 = arith.constant 1.000000e+00 : f32
    %88 = vector.broadcast %cst_26 : f32 to vector<8x128xf32>
    %89 = arith.addf %88, %87 : vector<8x128xf32>
    %90 = arith.divf %88, %89 : vector<8x128xf32>
    %91 = vector.extract_strided_slice %78 {offsets = [0, 256], sizes = [8, 128], strides = [1, 1]} : vector<8x512xf32> to vector<8x128xf32>
    %92 = math.tanh %91 : vector<8x128xf32>
    %93 = vector.extract_strided_slice %78 {offsets = [0, 384], sizes = [8, 128], strides = [1, 1]} : vector<8x512xf32> to vector<8x128xf32>
    %94 = arith.negf %93 : vector<8x128xf32>
    %95 = math.exp %94 : vector<8x128xf32>
    %cst_27 = arith.constant 1.000000e+00 : f32
    %96 = vector.broadcast %cst_27 : f32 to vector<8x128xf32>
    %97 = arith.addf %96, %95 : vector<8x128xf32>
    %98 = arith.divf %96, %97 : vector<8x128xf32>
    %99 = arith.mulf %90, %67 : vector<8x128xf32>
    %100 = arith.mulf %84, %92 : vector<8x128xf32>
    %101 = arith.addf %99, %100 : vector<8x128xf32>
    %102 = math.tanh %101 : vector<8x128xf32>
    %103 = arith.mulf %98, %102 : vector<8x128xf32>
    %104 = arith.index_cast %c2_i32 : i32 to index
    %c0_28 = arith.constant 0 : index
    %c0_29 = arith.constant 0 : index
    %105 = vector.load %arg5[%104, %c0_28, %c0_29] : memref<8x8x128xf32, #tpu.memory_space<vmem>>, vector<1x8x128xf32>
    %106 = vector.shape_cast %105 : vector<1x8x128xf32> to vector<8x128xf32>
    %107 = vector.shape_cast %103 : vector<8x128xf32> to vector<1x8x128xf32>
    tpu.vector_store %arg5[%104, %c0_28, %c0_29], %107 {strides = array<i32>} : memref<8x8x128xf32, #tpu.memory_space<vmem>>, vector<1x8x128xf32>,
    %c3_i32 = arith.constant 3 : i32
    %108 = arith.index_cast %c3_i32 : i32 to index
    %c0_30 = arith.constant 0 : index
    %c0_31 = arith.constant 0 : index
    %109 = vector.load %arg1[%108, %c0_30, %c0_31] : memref<8x8x512xf32, #tpu.memory_space<vmem>>, vector<1x8x512xf32>
    %110 = vector.shape_cast %109 : vector<1x8x512xf32> to vector<8x512xf32>
    %cst_32 = arith.constant dense<0.000000e+00> : vector<8x512xf32>
    %111 = tpu.matmul %103, %3, %cst_32 {dimension_numbers = #tpu.dot_dimension_numbers<[1], [0], [0], [1], [0, 0, 1, 1], [], []>} : vector<8x128xf32>, vector<128x512xf32>, vector<8x512xf32> -> vector<8x512xf32>
    %112 = arith.addf %110, %111 : vector<8x512xf32>
    %113 = vector.extract_strided_slice %112 {offsets = [0, 0], sizes = [8, 128], strides = [1, 1]} : vector<8x512xf32> to vector<8x128xf32>
    %114 = arith.negf %113 : vector<8x128xf32>
    %115 = math.exp %114 : vector<8x128xf32>
    %cst_33 = arith.constant 1.000000e+00 : f32
    %116 = vector.broadcast %cst_33 : f32 to vector<8x128xf32>
    %117 = arith.addf %116, %115 : vector<8x128xf32>
    %118 = arith.divf %116, %117 : vector<8x128xf32>
    %119 = vector.extract_strided_slice %112 {offsets = [0, 128], sizes = [8, 128], strides = [1, 1]} : vector<8x512xf32> to vector<8x128xf32>
    %120 = arith.negf %119 : vector<8x128xf32>
    %121 = math.exp %120 : vector<8x128xf32>
    %cst_34 = arith.constant 1.000000e+00 : f32
    %122 = vector.broadcast %cst_34 : f32 to vector<8x128xf32>
    %123 = arith.addf %122, %121 : vector<8x128xf32>
    %124 = arith.divf %122, %123 : vector<8x128xf32>
    %125 = vector.extract_strided_slice %112 {offsets = [0, 256], sizes = [8, 128], strides = [1, 1]} : vector<8x512xf32> to vector<8x128xf32>
    %126 = math.tanh %125 : vector<8x128xf32>
    %127 = vector.extract_strided_slice %112 {offsets = [0, 384], sizes = [8, 128], strides = [1, 1]} : vector<8x512xf32> to vector<8x128xf32>
    %128 = arith.negf %127 : vector<8x128xf32>
    %129 = math.exp %128 : vector<8x128xf32>
    %cst_35 = arith.constant 1.000000e+00 : f32
    %130 = vector.broadcast %cst_35 : f32 to vector<8x128xf32>
    %131 = arith.addf %130, %129 : vector<8x128xf32>
    %132 = arith.divf %130, %131 : vector<8x128xf32>
    %133 = arith.mulf %124, %101 : vector<8x128xf32>
    %134 = arith.mulf %118, %126 : vector<8x128xf32>
    %135 = arith.addf %133, %134 : vector<8x128xf32>
    %136 = math.tanh %135 : vector<8x128xf32>
    %137 = arith.mulf %132, %136 : vector<8x128xf32>
    %138 = arith.index_cast %c3_i32 : i32 to index
    %c0_36 = arith.constant 0 : index
    %c0_37 = arith.constant 0 : index
    %139 = vector.load %arg5[%138, %c0_36, %c0_37] : memref<8x8x128xf32, #tpu.memory_space<vmem>>, vector<1x8x128xf32>
    %140 = vector.shape_cast %139 : vector<1x8x128xf32> to vector<8x128xf32>
    %141 = vector.shape_cast %137 : vector<8x128xf32> to vector<1x8x128xf32>
    tpu.vector_store %arg5[%138, %c0_36, %c0_37], %141 {strides = array<i32>} : memref<8x8x128xf32, #tpu.memory_space<vmem>>, vector<1x8x128xf32>,
    %c4_i32 = arith.constant 4 : i32
    %142 = arith.index_cast %c4_i32 : i32 to index
    %c0_38 = arith.constant 0 : index
    %c0_39 = arith.constant 0 : index
    %143 = vector.load %arg1[%142, %c0_38, %c0_39] : memref<8x8x512xf32, #tpu.memory_space<vmem>>, vector<1x8x512xf32>
    %144 = vector.shape_cast %143 : vector<1x8x512xf32> to vector<8x512xf32>
    %cst_40 = arith.constant dense<0.000000e+00> : vector<8x512xf32>
    %145 = tpu.matmul %137, %3, %cst_40 {dimension_numbers = #tpu.dot_dimension_numbers<[1], [0], [0], [1], [0, 0, 1, 1], [], []>} : vector<8x128xf32>, vector<128x512xf32>, vector<8x512xf32> -> vector<8x512xf32>
    %146 = arith.addf %144, %145 : vector<8x512xf32>
    %147 = vector.extract_strided_slice %146 {offsets = [0, 0], sizes = [8, 128], strides = [1, 1]} : vector<8x512xf32> to vector<8x128xf32>
    %148 = arith.negf %147 : vector<8x128xf32>
    %149 = math.exp %148 : vector<8x128xf32>
    %cst_41 = arith.constant 1.000000e+00 : f32
    %150 = vector.broadcast %cst_41 : f32 to vector<8x128xf32>
    %151 = arith.addf %150, %149 : vector<8x128xf32>
    %152 = arith.divf %150, %151 : vector<8x128xf32>
    %153 = vector.extract_strided_slice %146 {offsets = [0, 128], sizes = [8, 128], strides = [1, 1]} : vector<8x512xf32> to vector<8x128xf32>
    %154 = arith.negf %153 : vector<8x128xf32>
    %155 = math.exp %154 : vector<8x128xf32>
    %cst_42 = arith.constant 1.000000e+00 : f32
    %156 = vector.broadcast %cst_42 : f32 to vector<8x128xf32>
    %157 = arith.addf %156, %155 : vector<8x128xf32>
    %158 = arith.divf %156, %157 : vector<8x128xf32>
    %159 = vector.extract_strided_slice %146 {offsets = [0, 256], sizes = [8, 128], strides = [1, 1]} : vector<8x512xf32> to vector<8x128xf32>
    %160 = math.tanh %159 : vector<8x128xf32>
    %161 = vector.extract_strided_slice %146 {offsets = [0, 384], sizes = [8, 128], strides = [1, 1]} : vector<8x512xf32> to vector<8x128xf32>
    %162 = arith.negf %161 : vector<8x128xf32>
    %163 = math.exp %162 : vector<8x128xf32>
    %cst_43 = arith.constant 1.000000e+00 : f32
    %164 = vector.broadcast %cst_43 : f32 to vector<8x128xf32>
    %165 = arith.addf %164, %163 : vector<8x128xf32>
    %166 = arith.divf %164, %165 : vector<8x128xf32>
    %167 = arith.mulf %158, %135 : vector<8x128xf32>
    %168 = arith.mulf %152, %160 : vector<8x128xf32>
    %169 = arith.addf %167, %168 : vector<8x128xf32>
    %170 = math.tanh %169 : vector<8x128xf32>
    %171 = arith.mulf %166, %170 : vector<8x128xf32>
    %172 = arith.index_cast %c4_i32 : i32 to index
    %c0_44 = arith.constant 0 : index
    %c0_45 = arith.constant 0 : index
    %173 = vector.load %arg5[%172, %c0_44, %c0_45] : memref<8x8x128xf32, #tpu.memory_space<vmem>>, vector<1x8x128xf32>
    %174 = vector.shape_cast %173 : vector<1x8x128xf32> to vector<8x128xf32>
    %175 = vector.shape_cast %171 : vector<8x128xf32> to vector<1x8x128xf32>
    tpu.vector_store %arg5[%172, %c0_44, %c0_45], %175 {strides = array<i32>} : memref<8x8x128xf32, #tpu.memory_space<vmem>>, vector<1x8x128xf32>,
    %c5_i32 = arith.constant 5 : i32
    %176 = arith.index_cast %c5_i32 : i32 to index
    %c0_46 = arith.constant 0 : index
    %c0_47 = arith.constant 0 : index
    %177 = vector.load %arg1[%176, %c0_46, %c0_47] : memref<8x8x512xf32, #tpu.memory_space<vmem>>, vector<1x8x512xf32>
    %178 = vector.shape_cast %177 : vector<1x8x512xf32> to vector<8x512xf32>
    %cst_48 = arith.constant dense<0.000000e+00> : vector<8x512xf32>
    %179 = tpu.matmul %171, %3, %cst_48 {dimension_numbers = #tpu.dot_dimension_numbers<[1], [0], [0], [1], [0, 0, 1, 1], [], []>} : vector<8x128xf32>, vector<128x512xf32>, vector<8x512xf32> -> vector<8x512xf32>
    %180 = arith.addf %178, %179 : vector<8x512xf32>
    %181 = vector.extract_strided_slice %180 {offsets = [0, 0], sizes = [8, 128], strides = [1, 1]} : vector<8x512xf32> to vector<8x128xf32>
    %182 = arith.negf %181 : vector<8x128xf32>
    %183 = math.exp %182 : vector<8x128xf32>
    %cst_49 = arith.constant 1.000000e+00 : f32
    %184 = vector.broadcast %cst_49 : f32 to vector<8x128xf32>
    %185 = arith.addf %184, %183 : vector<8x128xf32>
    %186 = arith.divf %184, %185 : vector<8x128xf32>
    %187 = vector.extract_strided_slice %180 {offsets = [0, 128], sizes = [8, 128], strides = [1, 1]} : vector<8x512xf32> to vector<8x128xf32>
    %188 = arith.negf %187 : vector<8x128xf32>
    %189 = math.exp %188 : vector<8x128xf32>
    %cst_50 = arith.constant 1.000000e+00 : f32
    %190 = vector.broadcast %cst_50 : f32 to vector<8x128xf32>
    %191 = arith.addf %190, %189 : vector<8x128xf32>
    %192 = arith.divf %190, %191 : vector<8x128xf32>
    %193 = vector.extract_strided_slice %180 {offsets = [0, 256], sizes = [8, 128], strides = [1, 1]} : vector<8x512xf32> to vector<8x128xf32>
    %194 = math.tanh %193 : vector<8x128xf32>
    %195 = vector.extract_strided_slice %180 {offsets = [0, 384], sizes = [8, 128], strides = [1, 1]} : vector<8x512xf32> to vector<8x128xf32>
    %196 = arith.negf %195 : vector<8x128xf32>
    %197 = math.exp %196 : vector<8x128xf32>
    %cst_51 = arith.constant 1.000000e+00 : f32
    %198 = vector.broadcast %cst_51 : f32 to vector<8x128xf32>
    %199 = arith.addf %198, %197 : vector<8x128xf32>
    %200 = arith.divf %198, %199 : vector<8x128xf32>
    %201 = arith.mulf %192, %169 : vector<8x128xf32>
    %202 = arith.mulf %186, %194 : vector<8x128xf32>
    %203 = arith.addf %201, %202 : vector<8x128xf32>
    %204 = math.tanh %203 : vector<8x128xf32>
    %205 = arith.mulf %200, %204 : vector<8x128xf32>
    %206 = arith.index_cast %c5_i32 : i32 to index
    %c0_52 = arith.constant 0 : index
    %c0_53 = arith.constant 0 : index
    %207 = vector.load %arg5[%206, %c0_52, %c0_53] : memref<8x8x128xf32, #tpu.memory_space<vmem>>, vector<1x8x128xf32>
    %208 = vector.shape_cast %207 : vector<1x8x128xf32> to vector<8x128xf32>
    %209 = vector.shape_cast %205 : vector<8x128xf32> to vector<1x8x128xf32>
    tpu.vector_store %arg5[%206, %c0_52, %c0_53], %209 {strides = array<i32>} : memref<8x8x128xf32, #tpu.memory_space<vmem>>, vector<1x8x128xf32>,
    %c6_i32 = arith.constant 6 : i32
    %210 = arith.index_cast %c6_i32 : i32 to index
    %c0_54 = arith.constant 0 : index
    %c0_55 = arith.constant 0 : index
    %211 = vector.load %arg1[%210, %c0_54, %c0_55] : memref<8x8x512xf32, #tpu.memory_space<vmem>>, vector<1x8x512xf32>
    %212 = vector.shape_cast %211 : vector<1x8x512xf32> to vector<8x512xf32>
    %cst_56 = arith.constant dense<0.000000e+00> : vector<8x512xf32>
    %213 = tpu.matmul %205, %3, %cst_56 {dimension_numbers = #tpu.dot_dimension_numbers<[1], [0], [0], [1], [0, 0, 1, 1], [], []>} : vector<8x128xf32>, vector<128x512xf32>, vector<8x512xf32> -> vector<8x512xf32>
    %214 = arith.addf %212, %213 : vector<8x512xf32>
    %215 = vector.extract_strided_slice %214 {offsets = [0, 0], sizes = [8, 128], strides = [1, 1]} : vector<8x512xf32> to vector<8x128xf32>
    %216 = arith.negf %215 : vector<8x128xf32>
    %217 = math.exp %216 : vector<8x128xf32>
    %cst_57 = arith.constant 1.000000e+00 : f32
    %218 = vector.broadcast %cst_57 : f32 to vector<8x128xf32>
    %219 = arith.addf %218, %217 : vector<8x128xf32>
    %220 = arith.divf %218, %219 : vector<8x128xf32>
    %221 = vector.extract_strided_slice %214 {offsets = [0, 128], sizes = [8, 128], strides = [1, 1]} : vector<8x512xf32> to vector<8x128xf32>
    %222 = arith.negf %221 : vector<8x128xf32>
    %223 = math.exp %222 : vector<8x128xf32>
    %cst_58 = arith.constant 1.000000e+00 : f32
    %224 = vector.broadcast %cst_58 : f32 to vector<8x128xf32>
    %225 = arith.addf %224, %223 : vector<8x128xf32>
    %226 = arith.divf %224, %225 : vector<8x128xf32>
    %227 = vector.extract_strided_slice %214 {offsets = [0, 256], sizes = [8, 128], strides = [1, 1]} : vector<8x512xf32> to vector<8x128xf32>
    %228 = math.tanh %227 : vector<8x128xf32>
    %229 = vector.extract_strided_slice %214 {offsets = [0, 384], sizes = [8, 128], strides = [1, 1]} : vector<8x512xf32> to vector<8x128xf32>
    %230 = arith.negf %229 : vector<8x128xf32>
    %231 = math.exp %230 : vector<8x128xf32>
    %cst_59 = arith.constant 1.000000e+00 : f32
    %232 = vector.broadcast %cst_59 : f32 to vector<8x128xf32>
    %233 = arith.addf %232, %231 : vector<8x128xf32>
    %234 = arith.divf %232, %233 : vector<8x128xf32>
    %235 = arith.mulf %226, %203 : vector<8x128xf32>
    %236 = arith.mulf %220, %228 : vector<8x128xf32>
    %237 = arith.addf %235, %236 : vector<8x128xf32>
    %238 = math.tanh %237 : vector<8x128xf32>
    %239 = arith.mulf %234, %238 : vector<8x128xf32>
    %240 = arith.index_cast %c6_i32 : i32 to index
    %c0_60 = arith.constant 0 : index
    %c0_61 = arith.constant 0 : index
    %241 = vector.load %arg5[%240, %c0_60, %c0_61] : memref<8x8x128xf32, #tpu.memory_space<vmem>>, vector<1x8x128xf32>
    %242 = vector.shape_cast %241 : vector<1x8x128xf32> to vector<8x128xf32>
    %243 = vector.shape_cast %239 : vector<8x128xf32> to vector<1x8x128xf32>
    tpu.vector_store %arg5[%240, %c0_60, %c0_61], %243 {strides = array<i32>} : memref<8x8x128xf32, #tpu.memory_space<vmem>>, vector<1x8x128xf32>,
    %c7_i32 = arith.constant 7 : i32
    %244 = arith.index_cast %c7_i32 : i32 to index
    %c0_62 = arith.constant 0 : index
    %c0_63 = arith.constant 0 : index
    %245 = vector.load %arg1[%244, %c0_62, %c0_63] : memref<8x8x512xf32, #tpu.memory_space<vmem>>, vector<1x8x512xf32>
    %246 = vector.shape_cast %245 : vector<1x8x512xf32> to vector<8x512xf32>
    %cst_64 = arith.constant dense<0.000000e+00> : vector<8x512xf32>
    %247 = tpu.matmul %239, %3, %cst_64 {dimension_numbers = #tpu.dot_dimension_numbers<[1], [0], [0], [1], [0, 0, 1, 1], [], []>} : vector<8x128xf32>, vector<128x512xf32>, vector<8x512xf32> -> vector<8x512xf32>
    %248 = arith.addf %246, %247 : vector<8x512xf32>
    %249 = vector.extract_strided_slice %248 {offsets = [0, 0], sizes = [8, 128], strides = [1, 1]} : vector<8x512xf32> to vector<8x128xf32>
    %250 = arith.negf %249 : vector<8x128xf32>
    %251 = math.exp %250 : vector<8x128xf32>
    %cst_65 = arith.constant 1.000000e+00 : f32
    %252 = vector.broadcast %cst_65 : f32 to vector<8x128xf32>
    %253 = arith.addf %252, %251 : vector<8x128xf32>
    %254 = arith.divf %252, %253 : vector<8x128xf32>
    %255 = vector.extract_strided_slice %248 {offsets = [0, 128], sizes = [8, 128], strides = [1, 1]} : vector<8x512xf32> to vector<8x128xf32>
    %256 = arith.negf %255 : vector<8x128xf32>
    %257 = math.exp %256 : vector<8x128xf32>
    %cst_66 = arith.constant 1.000000e+00 : f32
    %258 = vector.broadcast %cst_66 : f32 to vector<8x128xf32>
    %259 = arith.addf %258, %257 : vector<8x128xf32>
    %260 = arith.divf %258, %259 : vector<8x128xf32>
    %261 = vector.extract_strided_slice %248 {offsets = [0, 256], sizes = [8, 128], strides = [1, 1]} : vector<8x512xf32> to vector<8x128xf32>
    %262 = math.tanh %261 : vector<8x128xf32>
    %263 = vector.extract_strided_slice %248 {offsets = [0, 384], sizes = [8, 128], strides = [1, 1]} : vector<8x512xf32> to vector<8x128xf32>
    %264 = arith.negf %263 : vector<8x128xf32>
    %265 = math.exp %264 : vector<8x128xf32>
    %cst_67 = arith.constant 1.000000e+00 : f32
    %266 = vector.broadcast %cst_67 : f32 to vector<8x128xf32>
    %267 = arith.addf %266, %265 : vector<8x128xf32>
    %268 = arith.divf %266, %267 : vector<8x128xf32>
    %269 = arith.mulf %260, %237 : vector<8x128xf32>
    %270 = arith.mulf %254, %262 : vector<8x128xf32>
    %271 = arith.addf %269, %270 : vector<8x128xf32>
    %272 = math.tanh %271 : vector<8x128xf32>
    %273 = arith.mulf %268, %272 : vector<8x128xf32>
    %274 = arith.index_cast %c7_i32 : i32 to index
    %c0_68 = arith.constant 0 : index
    %c0_69 = arith.constant 0 : index
    %275 = vector.load %arg5[%274, %c0_68, %c0_69] : memref<8x8x128xf32, #tpu.memory_space<vmem>>, vector<1x8x128xf32>
    %276 = vector.shape_cast %275 : vector<1x8x128xf32> to vector<8x128xf32>
    %277 = vector.shape_cast %273 : vector<8x128xf32> to vector<1x8x128xf32>
    tpu.vector_store %arg5[%274, %c0_68, %c0_69], %277 {strides = array<i32>} : memref<8x8x128xf32, #tpu.memory_space<vmem>>, vector<1x8x128xf32>,
    %c8_i32 = arith.constant 8 : i32
    %c0_70 = arith.constant 0 : index
    %c0_71 = arith.constant 0 : index
    %278 = vector.load %arg6[%c0_70, %c0_71] : memref<8x128xf32, #tpu.memory_space<vmem>>, vector<8x128xf32>
    tpu.vector_store %arg6[%c0_70, %c0_71], %273 {strides = array<i32>} : memref<8x128xf32, #tpu.memory_space<vmem>>, vector<8x128xf32>,
    %c0_72 = arith.constant 0 : index
    %c0_73 = arith.constant 0 : index
    %279 = vector.load %arg7[%c0_72, %c0_73] : memref<8x128xf32, #tpu.memory_space<vmem>>, vector<8x128xf32>
    tpu.vector_store %arg7[%c0_72, %c0_73], %271 {strides = array<i32>} : memref<8x128xf32, #tpu.memory_space<vmem>>, vector<8x128xf32>,
    return
  }
  func.func @transform_0(%arg0: i32) -> (i32, i32, i32) {
    %c0_i32 = arith.constant 0 : i32
    %c0_i32_0 = arith.constant 0 : i32
    %c0_i32_1 = arith.constant 0 : i32
    return %arg0, %c0_i32, %c0_i32_0 : i32, i32, i32
  }
  func.func @transform_1(%arg0: i32) -> (i32, i32) {
    %c0_i32 = arith.constant 0 : i32
    %c0_i32_0 = arith.constant 0 : i32
    %c0_i32_1 = arith.constant 0 : i32
    return %c0_i32, %c0_i32_0 : i32, i32
  }
  func.func @transform_2(%arg0: i32) -> (i32, i32) {
    %c0_i32 = arith.constant 0 : i32
    %c0_i32_0 = arith.constant 0 : i32
    %c0_i32_1 = arith.constant 0 : i32
    return %c0_i32, %c0_i32_0 : i32, i32
  }
  func.func @transform_3(%arg0: i32) -> (i32, i32) {
    %c0_i32 = arith.constant 0 : i32
    %c0_i32_0 = arith.constant 0 : i32
    %c0_i32_1 = arith.constant 0 : i32
    return %c0_i32, %c0_i32_0 : i32, i32
  }
  func.func @transform_4(%arg0: i32) -> (i32, i32, i32) {
    %c0_i32 = arith.constant 0 : i32
    %c0_i32_0 = arith.constant 0 : i32
    %c0_i32_1 = arith.constant 0 : i32
    return %arg0, %c0_i32, %c0_i32_0 : i32, i32, i32
  }
  func.func @transform_5(%arg0: i32) -> (i32, i32) {
    %c0_i32 = arith.constant 0 : i32
    %c0_i32_0 = arith.constant 0 : i32
    %c0_i32_1 = arith.constant 0 : i32
    return %c0_i32, %c0_i32_0 : i32, i32
  }
  func.func @transform_6(%arg0: i32) -> (i32, i32) {
    %c0_i32 = arith.constant 0 : i32
    %c0_i32_0 = arith.constant 0 : i32
    %c0_i32_1 = arith.constant 0 : i32
    return %c0_i32, %c0_i32_0 : i32, i32
  }
}

</mosaic_0001>

<bundles_post_ra>
// kernel: tpu_custom_call.1
= control target key start
LH: loop header
LB: loop body
LE: loop exit
PB: predicated region body
PF: predicated region fallthrough
CT: control target
= control target key end

     0   :  { %12 = vsyncpa [#allocation3], 0  ;;  %s2974_s0 = inlined_call_operand.hbm [shape: f32[8,8,512], index: 0, kind: input, shape index: {}]   ;;  %s2975_s1 = inlined_call_operand.hbm [shape: f32[8,128], index: 1, kind: input, shape index: {}]   ;;  %s2976_s2 = inlined_call_operand.hbm [shape: f32[8,128], index: 2, kind: input, shape index: {}]   ;;  %s2977_s3 = inlined_call_operand.hbm [shape: f32[128,512], index: 3, kind: input, shape index: {}]   ;;  %s2978_s4 = inlined_call_operand.hbm [shape: f32[8,8,128], index: 4, kind: output, shape index: {0}]   ;;  %s2979_s5 = inlined_call_operand.hbm [shape: f32[8,128], index: 5, kind: output, shape index: {1}]   ;;  %s2980_s6 = inlined_call_operand.hbm [shape: f32[8,128], index: 6, kind: output, shape index: {2}]  }
   0x1   :  { %13 = vsyncpa [#allocation6], 0 }
   0x2   :  { %14 = vsyncpa [#allocation9], 0 }
   0x3   :  { %15 = vsyncpa [#allocation4], 0 }
   0x4   :  { %16 = vsyncpa [#allocation12], 0  ;;  %s2449_s21 = smov [#allocation5]   ;;  %s2450_s23 = smov [#allocation2]  }
   0x5   :  { %s35_s22 = sshll.u32 %s2449_s21, 4  ;;  %s22_s24 = sshll.u32 %s2450_s23, 4  ;;  %s36_s22 = int_to_ptr.vmem [resolvable:$true] %s35_s22  ;;  %s2496_s24 = int_to_ptr.vmem [resolvable:$true] %s22_s24 }
   0x6   :  { %s2285_s27 = scalar_lea.hbm %s2975_s1, 128 }
   0x7   :  { %p2286_p0 = scmp.ne.s32.totalorder %s2975_s1, %s2285_s27  ;;  %p2289_p1 = scmp.lt.u32.totalorder %s2285_s27, %s2975_s1 }
   0x9   :  { %p2291_p2 = pnand %p2289_p1, %p2286_p0 }
   0xb   :  { %2294 = shalt.err (!%p2291_p2)
}
   0xc   :  { %s2295_s8 = scalar_lea.vmem %s36_s22, 128  ;;  %p2300_p4 = scmp.lt.s32.totalorder %s36_s22, %s36_s22 }
   0xd   :  { %p2296_p3 = scmp.ne.s32.totalorder %s36_s22, %s2295_s8  ;;  %p2301_p5 = scmp.lt.s32.totalorder %s2295_s8, %s2295_s8 }
   0xf   :  { %p2302_p6 = por %p2301_p5, %p2300_p4 }
  0x11   :  { %p2303_p7 = pnand %p2302_p6, %p2296_p3 }
  0x13   :  { %2306 = shalt.err (!%p2303_p7)
}
  0x14   :  { %38 = dma.hbm_to_vmem [thread:$0]  %s2975_s1, 128, %s36_s22, [#allocation6]  }
  0x15   :  { %s2307_s13 = scalar_lea.hbm %s2974_s0, 4096 }
  0x16   :  { %p2308_p8 = scmp.ne.s32.totalorder %s2974_s0, %s2307_s13  ;;  %p2311_p9 = scmp.lt.u32.totalorder %s2307_s13, %s2974_s0 }
  0x18   :  { %p2313_p10 = pnand %p2311_p9, %p2308_p8 }
  0x1a   :  { %2316 = shalt.err (!%p2313_p10)
}
  0x1b   :  { %s2317_s18 = scalar_lea.vmem %s2496_s24, 4096  ;;  %p2322_p12 = scmp.lt.s32.totalorder %s2496_s24, %s2496_s24 }
  0x1c   :  { %p2318_p11 = scmp.ne.s32.totalorder %s2496_s24, %s2317_s18  ;;  %p2323_p13 = scmp.lt.s32.totalorder %s2317_s18, %s2317_s18 }
  0x1e   :  { %p2324_p0 = por %p2323_p13, %p2322_p12 }
  0x20   :  { %p2325_p1 = pnand %p2324_p0, %p2318_p11 }
  0x22   :  { %2328 = shalt.err (!%p2325_p1)
}
  0x23   :  { %s2451_s1 = smov 512   ;;  %s2452_s19 = smov 32  }
  0x24   :  { %28 = dma.hbm_to_vmem [thread:$0]  %s2974_s0, 4096, %s2496_s24, [#allocation3], %s2451_s1, %s2451_s1, %s2452_s19  }
  0x25   :  { %s2453_s22 = smov [#allocation7]   ;;  %s2454_s25 = smov [#allocation8]  }
  0x26   :  { %s45_s23 = sshll.u32 %s2453_s22, 4  ;;  %s54_s26 = sshll.u32 %s2454_s25, 4  ;;  %s46_s23 = int_to_ptr.vmem [resolvable:$true] %s45_s23  ;;  %s2530_s26 = int_to_ptr.vmem [resolvable:$true] %s54_s26 }
  0x27   :  { %s2329_s29 = scalar_lea.hbm %s2976_s2, 128 }
  0x28   :  { %p2330_p2 = scmp.ne.s32.totalorder %s2976_s2, %s2329_s29  ;;  %p2333_p3 = scmp.lt.u32.totalorder %s2329_s29, %s2976_s2 }
  0x2a   :  { %p2335_p4 = pnand %p2333_p3, %p2330_p2 }
  0x2c   :  { %2338 = shalt.err (!%p2335_p4)
}
  0x2d   :  { %s2339_s0 = scalar_lea.vmem %s46_s23, 128  ;;  %p2344_p6 = scmp.lt.s32.totalorder %s46_s23, %s46_s23 }
  0x2e   :  { %p2340_p5 = scmp.ne.s32.totalorder %s46_s23, %s2339_s0  ;;  %p2345_p7 = scmp.lt.s32.totalorder %s2339_s0, %s2339_s0 }
  0x30   :  { %p2346_p8 = por %p2345_p7, %p2344_p6 }
  0x32   :  { %p2347_p9 = pnand %p2346_p8, %p2340_p5 }
  0x34   :  { %2350 = shalt.err (!%p2347_p9)
}
  0x35   :  { %48 = dma.hbm_to_vmem [thread:$0]  %s2976_s2, 128, %s46_s23, [#allocation6]  }
  0x36   :  { %s2351_s13 = scalar_lea.hbm %s2977_s3, 8192 }
  0x37   :  { %p2352_p10 = scmp.ne.s32.totalorder %s2977_s3, %s2351_s13  ;;  %p2355_p11 = scmp.lt.u32.totalorder %s2351_s13, %s2977_s3 }
  0x39   :  { %p2357_p12 = pnand %p2355_p11, %p2352_p10 }
  0x3b   :  { %2360 = shalt.err (!%p2357_p12)
}
  0x3c   :  { %s2361_s18 = scalar_lea.vmem %s2530_s26, 8192  ;;  %p2366_p0 = scmp.lt.s32.totalorder %s2530_s26, %s2530_s26 }
  0x3d   :  { %p2362_p13 = scmp.ne.s32.totalorder %s2530_s26, %s2361_s18  ;;  %p2367_p1 = scmp.lt.s32.totalorder %s2361_s18, %s2361_s18 }
  0x3f   :  { %p2368_p2 = por %p2367_p1, %p2366_p0 }
  0x41   :  { %p2369_p3 = pnand %p2368_p2, %p2362_p13 }
  0x43   :  { %2372 = shalt.err (!%p2369_p3)
}
  0x44   :  { %60 = dma.hbm_to_vmem [thread:$0]  %s2977_s3, 8192, %s2530_s26, [#allocation9], %s2451_s1, %s2451_s1, %s2452_s19  }
  0x45   :  { %2439 = dma.done.wait [#allocation3], 4096  }
  0x46   :  { %2440 = vsyncadd [#allocation3], 4294963200 }
  0x47   :  { %2441 = dma.done.wait [#allocation6], 256  }
  0x48   :  { %2442 = vsyncadd [#allocation6], 4294967040 }
  0x49   :  { %2443 = dma.done.wait [#allocation9], 8192  }
  0x4a   :  { %2444 = vsyncadd [#allocation9], 4294959104  ;;  %v2455_v0 = vmov 0.0   ;;  %v82_v1 = vld [vmem:[#allocation8 + $0x8] sm:$0xff]  ;;  %v81_v3 = vld [vmem:[#allocation8] sm:$0xff]  ;;  %s2456_s3 = smov [#allocation11]  }
  0x4b   :  { %215 = vmatprep.mubr.f32.mxu0 %v2455_v0  ;;  %286 = vmatprep.mubr.f32.mxu1 %v2455_v0  ;;  %v86_v2 = vld [vmem:[#allocation8 + $0x28] sm:$0xff]  ;;  %v85_v5 = vld [vmem:[#allocation8 + $0x20] sm:$0xff]  ;;  %v84_v19 = vld [vmem:[#allocation8 + $0x18] sm:$0xff]  ;;  %s1581_s1 = sshll.u32 %s2456_s3, 4  ;;  %s2457_s19 = smov [#allocation10]   ;;  %s1582_s1 = int_to_ptr.vmem [resolvable:$true] %s1581_s1 }
  0x4c   :  { %v2566_v4 = vpack.c.bf16 %v86_v2, %v82_v1  ;;  %v90_v6 = vld [vmem:[#allocation8 + $0x48] sm:$0xff]  ;;  %v2568_v8 = vpack.c.bf16 %v85_v5, %v81_v3  ;;  %v89_v10 = vld [vmem:[#allocation8 + $0x40] sm:$0xff]  ;;  %v88_v20 = vld [vmem:[#allocation8 + $0x38] sm:$0xff]  ;;  %s1568_s21 = sshll.u32 %s2457_s19, 4  ;;  %s2458_s22 = smov [#allocation13]   ;;  %s2924_s21 = int_to_ptr.vmem [resolvable:$true] %s1568_s21 }
  0x4d   :  { %v94_v7 = vld [vmem:[#allocation8 + $0x68] sm:$0xff]  ;;  %v93_v11 = vld [vmem:[#allocation8 + $0x60] sm:$0xff]  ;;  %v2579_v22 = vpack.c.bf16 %v88_v20, %v84_v19  ;;  %v83_v23 = vld [vmem:[#allocation8 + $0x10] sm:$0xff]  ;;  %s1591_s23 = sshll.u32 %s2458_s22, 4  ;;  %s2373_s25 = scalar_lea.vmem %s1582_s1, 128  ;;  %s2926_s23 = int_to_ptr.vmem [resolvable:$true] %s1591_s23 }
  0x4e   :  { %v2570_v9 = vpack.c.bf16 %v94_v7, %v90_v6  ;;  %v98_v12 = vld [vmem:[#allocation8 + $0x88] sm:$0xff]  ;;  %1634 = vmatprep.subr.bf16.mxu0 %v2566_v4  ;;  %v2574_v14 = vpack.c.bf16 %v93_v11, %v89_v10  ;;  %v97_v15 = vld [vmem:[#allocation8 + $0x80] sm:$0xff]  ;;  %v87_v24 = vld [vmem:[#allocation8 + $0x30] sm:$0xff]  ;;  %p2374_p4 = scmp.ne.s32.totalorder %s1582_s1, %s2373_s25  ;;  %p2378_p5 = scmp.lt.s32.totalorder %s1582_s1, %s1582_s1 }
  0x4f   :  { %v102_v13 = vld [vmem:[#allocation8 + $0xa8] sm:$0xff]  ;;  %1636 = vmatpush1.bf16.msra.mxu0 %v2568_v8  ;;  %v101_v16 = vld [vmem:[#allocation8 + $0xa0] sm:$0xff]  ;;  %v2581_v25 = vpack.c.bf16 %v87_v24, %v83_v23  ;;  %1666 = vmatprep.subr.bf16.mxu1 %v2579_v22  ;;  %v92_v27 = vld [vmem:[#allocation8 + $0x58] sm:$0xff]  ;;  %p2379_p6 = scmp.lt.s32.totalorder %s2373_s25, %s2373_s25 }
  0x50   :  { %1638 = vmatprep.subr.bf16.mxu0 %v2570_v9  ;;  %v2577_v17 = vpack.c.bf16 %v102_v13, %v98_v12  ;;  %v106_v18 = vld [vmem:[#allocation8 + $0xc8] sm:$0xff]  ;;  %v2584_v26 = vpack.c.bf16 %v101_v16, %v97_v15  ;;  %v96_v28 = vld [vmem:[#allocation8 + $0x78] sm:$0xff]  ;;  %v91_v29 = vld [vmem:[#allocation8 + $0x50] sm:$0xff] }
  0x51   :  { %v110_v21 = vld [vmem:[#allocation8 + $0xe8] sm:$0xff]  ;;  %v105_v31 = vld [vmem:[#allocation8 + $0xc0] sm:$0xff]  ;;  %1668 = vmatpush1.bf16.msra.mxu1 %v2581_v25  ;;  %v2591_v33 = vpack.c.bf16 %v96_v28, %v92_v27  ;;  %v95_v34 = vld [vmem:[#allocation8 + $0x70] sm:$0xff]  ;;  %p2380_p7 = por %p2379_p6, %p2378_p5 }
  0x52   :  { %v2588_v30 = vpack.c.bf16 %v110_v21, %v106_v18  ;;  %v109_v32 = vld [vmem:[#allocation8 + $0xe0] sm:$0xff]  ;;  %v114_v35 = vld [vmem:[#allocation8 + $0x108] sm:$0xff]  ;;  %v2593_v37 = vpack.c.bf16 %v95_v34, %v91_v29  ;;  %v100_v38 = vld [vmem:[#allocation8 + $0x98] sm:$0xff] }
  0x53   :  { %1640 = vmatpush1.bf16.msra.mxu0 %v2574_v14  ;;  %v118_v36 = vld [vmem:[#allocation8 + $0x128] sm:$0xff]  ;;  %1670 = vmatprep.subr.bf16.mxu1 %v2591_v33  ;;  %v104_v39 = vld [vmem:[#allocation8 + $0xb8] sm:$0xff]  ;;  %v99_v40 = vld [vmem:[#allocation8 + $0x90] sm:$0xff]  ;;  %v2597_v42 = vpack.c.bf16 %v109_v32, %v105_v31  ;;  %p2381_p8 = pnand %p2380_p7, %p2374_p4 }
  0x54   :  { %1642 = vmatprep.subr.bf16.mxu0 %v2577_v17  ;;  %v103_v41 = vld [vmem:[#allocation8 + $0xb0] sm:$0xff]  ;;  %v113_v43 = vld [vmem:[#allocation8 + $0x100] sm:$0xff]  ;;  %v2599_v45 = vpack.c.bf16 %v104_v39, %v100_v38  ;;  %v2602_v46 = vpack.c.bf16 %v118_v36, %v114_v35  ;;  %v122_v47 = vld [vmem:[#allocation8 + $0x148] sm:$0xff] }
  0x55   :  { %v117_v44 = vld [vmem:[#allocation8 + $0x120] sm:$0xff]  ;;  %1672 = vmatpush1.bf16.msra.mxu1 %v2593_v37  ;;  %v2605_v48 = vpack.c.bf16 %v103_v41, %v99_v40  ;;  %v108_v49 = vld [vmem:[#allocation8 + $0xd8] sm:$0xff]  ;;  %v126_v51 = vld [vmem:[#allocation8 + $0x168] sm:$0xff] }
  0x56   :  { %v112_v50 = vld [vmem:[#allocation8 + $0xf8] sm:$0xff]  ;;  %1674 = vmatprep.subr.bf16.mxu1 %v2599_v45  ;;  %v107_v53 = vld [vmem:[#allocation8 + $0xd0] sm:$0xff]  ;;  %v2611_v55 = vpack.c.bf16 %v117_v44, %v113_v43  ;;  %v2614_v58 = vpack.c.bf16 %v126_v51, %v122_v47  ;;  %v121_v59 = vld [vmem:[#allocation8 + $0x140] sm:$0xff] }
  0x57   :  { %1644 = vmatpush1.bf16.msra.mxu0 %v2584_v26  ;;  %v2608_v52 = vpack.c.bf16 %v112_v50, %v108_v49  ;;  %v111_v54 = vld [vmem:[#allocation8 + $0xf0] sm:$0xff]  ;;  %v116_v56 = vld [vmem:[#allocation8 + $0x118] sm:$0xff]  ;;  %v125_v60 = vld [vmem:[#allocation8 + $0x160] sm:$0xff] }
  0x58   :  { %1646 = vmatprep.subr.bf16.mxu0 %v2588_v30  ;;  %v120_v57 = vld [vmem:[#allocation8 + $0x138] sm:$0xff]  ;;  %v130_v61 = vld [vmem:[#allocation8 + $0x188] sm:$0xff]  ;;  %v2617_v62 = vpack.c.bf16 %v111_v54, %v107_v53  ;;  %v115_v2 = vld [vmem:[#allocation8 + $0x110] sm:$0xff]  ;;  %v2623_v7 = vpack.c.bf16 %v125_v60, %v121_v59 }
  0x59   :  { %1676 = vmatpush1.bf16.msra.mxu1 %v2605_v48  ;;  %v134_v63 = vld [vmem:[#allocation8 + $0x1a8] sm:$0xff]  ;;  %v2620_v1 = vpack.c.bf16 %v120_v57, %v116_v56  ;;  %v119_v3 = vld [vmem:[#allocation8 + $0x130] sm:$0xff]  ;;  %v124_v5 = vld [vmem:[#allocation8 + $0x158] sm:$0xff] }
  0x5a   :  { %1678 = vmatprep.subr.bf16.mxu1 %v2608_v52  ;;  %v128_v6 = vld [vmem:[#allocation8 + $0x178] sm:$0xff]  ;;  %v2626_v10 = vpack.c.bf16 %v134_v63, %v130_v61  ;;  %v129_v11 = vld [vmem:[#allocation8 + $0x180] sm:$0xff]  ;;  %v138_v13 = vld [vmem:[#allocation8 + $0x1c8] sm:$0xff]  ;;  %v2629_v15 = vpack.c.bf16 %v119_v3, %v115_v2 }
  0x5b   :  { %1648 = vmatpush1.bf16.msra.mxu0 %v2597_v42  ;;  %v133_v12 = vld [vmem:[#allocation8 + $0x1a0] sm:$0xff]  ;;  %v142_v16 = vld [vmem:[#allocation8 + $0x1e8] sm:$0xff]  ;;  %v2632_v18 = vpack.c.bf16 %v128_v6, %v124_v5  ;;  %v123_v19 = vld [vmem:[#allocation8 + $0x150] sm:$0xff] }
  0x5c   :  { %1650 = vmatprep.subr.bf16.mxu0 %v2602_v46  ;;  %v127_v20 = vld [vmem:[#allocation8 + $0x170] sm:$0xff]  ;;  %v132_v21 = vld [vmem:[#allocation8 + $0x198] sm:$0xff]  ;;  %v2635_v24 = vpack.c.bf16 %v133_v12, %v129_v11  ;;  %v2638_v27 = vpack.c.bf16 %v142_v16, %v138_v13  ;;  %v137_v28 = vld [vmem:[#allocation8 + $0x1c0] sm:$0xff] }
  0x5d   :  { %1680 = vmatpush1.bf16.msra.mxu1 %v2617_v62  ;;  %v136_v23 = vld [vmem:[#allocation8 + $0x1b8] sm:$0xff]  ;;  %v141_v29 = vld [vmem:[#allocation8 + $0x1e0] sm:$0xff]  ;;  %v2641_v31 = vpack.c.bf16 %v127_v20, %v123_v19  ;;  %v131_v34 = vld [vmem:[#allocation8 + $0x190] sm:$0xff] }
  0x5e   :  { %1682 = vmatprep.subr.bf16.mxu1 %v2620_v1  ;;  %v2644_v32 = vpack.c.bf16 %v136_v23, %v132_v21  ;;  %v135_v35 = vld [vmem:[#allocation8 + $0x1b0] sm:$0xff]  ;;  %v140_v36 = vld [vmem:[#allocation8 + $0x1d8] sm:$0xff]  ;;  %v2647_v39 = vpack.c.bf16 %v141_v29, %v137_v28  ;;  %v150_v61 = vld [vmem:[#allocation2 + $0x18] sm:$0xff] }
  0x5f   :  { %1652 = vmatpush1.bf16.msra.mxu0 %v2611_v55  ;;  %v144_v38 = vld [vmem:[#allocation8 + $0x1f8] sm:$0xff]  ;;  %v2651_v40 = vpack.c.bf16 %v135_v35, %v131_v34  ;;  %v139_v43 = vld [vmem:[#allocation8 + $0x1d0] sm:$0xff]  ;;  %v149_v5 = vld [vmem:[#allocation2 + $0x10] sm:$0xff] }
  0x60   :  { %1654 = vmatprep.subr.bf16.mxu0 %v2614_v58  ;;  %v2654_v41 = vpack.c.bf16 %v144_v38, %v140_v36  ;;  %v143_v44 = vld [vmem:[#allocation8 + $0x1f0] sm:$0xff]  ;;  %v148_v51 = vld [vmem:[#allocation2 + $0x8] sm:$0xff] }
  0x61   :  { %1684 = vmatpush1.bf16.msra.mxu1 %v2629_v15  ;;  %v77_v47 = vld [vmem:[#allocation5] sm:$0xff]  ;;  %v2658_v49 = vpack.c.bf16 %v143_v44, %v139_v43  ;;  %v79_v23 = vld [vmem:[#allocation7] sm:$0xff] }
  0x62   :  { %1686 = vmatprep.subr.bf16.mxu1 %v2632_v18  ;;  %v147_v50 = vld [vmem:[#allocation2] sm:$0xff] }
  0x63   :  { %1656 = vmatpush1.bf16.msra.mxu0 %v2623_v7 }
  0x64   :  { %1658 = vmatprep.subr.bf16.mxu0 %v2626_v10 }
  0x65   :  { %1688 = vmatpush1.bf16.msra.mxu1 %v2641_v31 }
  0x66   :  { %1690 = vmatprep.subr.bf16.mxu1 %v2644_v32 }
  0x67   :  { %1660 = vmatpush1.bf16.msra.mxu0 %v2635_v24 }
  0x68   :  { %1662 = vmatprep.subr.bf16.mxu0 %v2638_v27 }
  0x69   :  { %1692 = vmatpush1.bf16.msra.mxu1 %v2651_v40 }
  0x6a   :  { %1694 = vmatprep.subr.bf16.mxu1 %v2654_v41 }
  0x6b   :  { %1664 = vmatpush1.bf16.msra.mxu0 %v2647_v39 }
  0x6c   :  { %1698 = vmatprep.subr.bf16.mxu0 %v2566_v4 }
  0x6d   :  { %1696 = vmatpush1.bf16.msra.mxu1 %v2658_v49 }
  0x6e   :  { %216 = vmatmul.mubr.f32.vlgmr.msra.gmra.mrb[0].mxu0 %v77_v47  ;;  %1730 = vmatprep.subr.bf16.mxu1 %v2579_v22 }
  0x6f   :  { %1700 = vmatpush1.bf16.msra.mxu0 %v2568_v8  ;;  %391 = vmatprep.mubr.f32.mxu0 %v2455_v0 }
  0x70   :  { %1702 = vmatprep.subr.bf16.mxu0 %v2570_v9  ;;  %287 = vmatmul.mubr.f32.vlgmr.msra.gmra.mrb[0].mxu1 %v77_v47 }
  0x71   :  { %1732 = vmatpush1.bf16.msra.mxu1 %v2581_v25  ;;  %462 = vmatprep.mubr.f32.mxu1 %v2455_v0 }
  0x72   :  { %1734 = vmatprep.subr.bf16.mxu1 %v2591_v33 }
  0x73   :  { %1704 = vmatpush1.bf16.msra.mxu0 %v2574_v14 }
  0x74   :  { %1706 = vmatprep.subr.bf16.mxu0 %v2577_v17 }
  0x75   :  { %1736 = vmatpush1.bf16.msra.mxu1 %v2593_v37 }
  0x76   :  { %1738 = vmatprep.subr.bf16.mxu1 %v2599_v45 }
  0x77   :  { %1708 = vmatpush1.bf16.msra.mxu0 %v2584_v26 }
  0x78   :  { %1710 = vmatprep.subr.bf16.mxu0 %v2588_v30 }
  0x79   :  { %1740 = vmatpush1.bf16.msra.mxu1 %v2605_v48 }
  0x7a   :  { %1742 = vmatprep.subr.bf16.mxu1 %v2608_v52 }
  0x7b   :  { %1712 = vmatpush1.bf16.msra.mxu0 %v2597_v42 }
  0x7c   :  { %1714 = vmatprep.subr.bf16.mxu0 %v2602_v46 }
  0x7d   :  { %1744 = vmatpush1.bf16.msra.mxu1 %v2617_v62 }
  0x7e   :  { %1746 = vmatprep.subr.bf16.mxu1 %v2620_v1 }
  0x7f   :  { %1716 = vmatpush1.bf16.msra.mxu0 %v2611_v55 }
  0x80   :  { %1718 = vmatprep.subr.bf16.mxu0 %v2614_v58 }
  0x81   :  { %1748 = vmatpush1.bf16.msra.mxu1 %v2629_v15 }
  0x82   :  { %1750 = vmatprep.subr.bf16.mxu1 %v2632_v18 }
  0x83   :  { %1720 = vmatpush1.bf16.msra.mxu0 %v2623_v7 }
  0x84   :  { %1722 = vmatprep.subr.bf16.mxu0 %v2626_v10 }
  0x85   :  { %1752 = vmatpush1.bf16.msra.mxu1 %v2641_v31 }
  0x86   :  { %1754 = vmatprep.subr.bf16.mxu1 %v2644_v32 }
  0x87   :  { %1724 = vmatpush1.bf16.msra.mxu0 %v2635_v24 }
  0x88   :  { %1726 = vmatprep.subr.bf16.mxu0 %v2638_v27 }
  0x89   :  { %1756 = vmatpush1.bf16.msra.mxu1 %v2651_v40 }
  0x8a   :  { %1758 = vmatprep.subr.bf16.mxu1 %v2654_v41 }
  0x8b   :  { %1728 = vmatpush1.bf16.msra.mxu0 %v2647_v39 }
  0x8c   :  { %1762 = vmatprep.subr.bf16.mxu0 %v2566_v4 }
  0x8d   :  { %1760 = vmatpush1.bf16.msra.mxu1 %v2658_v49 }
  0x8e   :  { %1794 = vmatprep.subr.bf16.mxu1 %v2579_v22 }
 0x141   :  { %v217_v53 = vpop.f32.mrb[0].mxu0 }
 0x142   :  { %v293_v54 = vadd.f32 %v217_v53, %v147_v50  ;;  %v219_v56 = vpop.f32.mrb[1].mxu0  ;;  %v323_v50 = vld [vmem:[#allocation2 + $0x20] sm:$0xff] }
 0x143   :  { %v294_v57 = vadd.f32 %v219_v56, %v148_v51  ;;  %v288_v63 = vpop.f32.mrb[0].mxu1  ;;  %v324_v51 = vld [vmem:[#allocation2 + $0x28] sm:$0xff] }
 0x144   :  { %v1609_v59 = vmul.f32 -1.442695, %v293_v54  ;;  %v290_v2 = vpop.f32.mrb[1].mxu1  ;;  %v295_v11 = vadd.f32 %v288_v63, %v149_v5  ;;  %v325_v5 = vld [vmem:[#allocation2 + $0x30] sm:$0xff] }
 0x145   :  { %v1610_v60 = vmul.f32 -1.442695, %v294_v57  ;;  %v296_v3 = vadd.f32 %v290_v2, %v150_v61  ;;  %v326_v2 = vld [vmem:[#allocation2 + $0x38] sm:$0xff] }
 0x146   :  { %2157 = vpow2.f32 %v1609_v59 }
 0x147   :  { %2159 = vpow2.f32 %v1610_v60  ;;  %v1611_v6 = vmul.f32 -1.442695, %v296_v3 }
 0x149   :  { %2161 = vpow2.f32 %v1611_v6 }
 0x14a   :  { %2163 = vtanh.f32 %v295_v11 }
 0x150   :  { %v2158_v12 = vpop.eup %2157 }
 0x151   :  { %v2160_v13 = vpop.eup %2159  ;;  %v300_v16 = vadd.f32 1.0, %v2158_v12 }
 0x152   :  { %v306_v19 = vadd.f32 1.0, %v2160_v13 }
 0x153   :  { %2165 = vrcp.f32 %v300_v16  ;;  %v2162_v20 = vpop.eup %2161 }
 0x154   :  { %2167 = vrcp.f32 %v306_v19  ;;  %v2164_v21 = vpop.eup %2163  ;;  %v313_v29 = vadd.f32 1.0, %v2162_v20 }
 0x156   :  { %2169 = vrcp.f32 %v313_v29 }
 0x15d   :  { %v2166_v28 = vpop.eup %2165 }
 0x15e   :  { %v2168_v34 = vpop.eup %2167  ;;  %v317_v35 = vmul.f32 %v2166_v28, %v2164_v21 }
 0x15f   :  { %v316_v36 = vmul.f32 %v2168_v34, %v79_v23 }
 0x160   :  { %v2170_v43 = vpop.eup %2169 }
 0x161   :  { %v2698_v38 = vadd.f32 %v317_v35, %v316_v36 }
 0x163   :  { %2171 = vtanh.f32 %v2698_v38 }
 0x16d   :  { %v2172_v44 = vpop.eup %2171 }
 0x16e   :  { %v320_v47 = vmul.f32 %v2172_v44, %v2170_v43 }
 0x170   :  { %321 = vst [vmem:[#allocation10] sm:$0xff] %v320_v47  ;;  %392 = vmatmul.mubr.f32.vlgmr.msra.gmra.mrb[2].mxu0 %v320_v47  ;;  %463 = vmatmul.mubr.f32.vlgmr.msra.gmra.mrb[2].mxu1 %v320_v47 }
 0x171   :  { %1764 = vmatpush1.bf16.msra.mxu0 %v2568_v8  ;;  %1796 = vmatpush1.bf16.msra.mxu1 %v2581_v25 }
 0x172   :  { %1766 = vmatprep.subr.bf16.mxu0 %v2570_v9  ;;  %1798 = vmatprep.subr.bf16.mxu1 %v2591_v33 }
 0x173   :  { %568 = vmatprep.mubr.f32.mxu0 %v2455_v0  ;;  %639 = vmatprep.mubr.f32.mxu1 %v2455_v0 }
 0x175   :  { %1768 = vmatpush1.bf16.msra.mxu0 %v2574_v14  ;;  %1800 = vmatpush1.bf16.msra.mxu1 %v2593_v37 }
 0x176   :  { %1770 = vmatprep.subr.bf16.mxu0 %v2577_v17  ;;  %1802 = vmatprep.subr.bf16.mxu1 %v2599_v45 }
 0x179   :  { %1772 = vmatpush1.bf16.msra.mxu0 %v2584_v26  ;;  %1804 = vmatpush1.bf16.msra.mxu1 %v2605_v48 }
 0x17a   :  { %1774 = vmatprep.subr.bf16.mxu0 %v2588_v30  ;;  %1806 = vmatprep.subr.bf16.mxu1 %v2608_v52 }
 0x17d   :  { %1776 = vmatpush1.bf16.msra.mxu0 %v2597_v42  ;;  %1808 = vmatpush1.bf16.msra.mxu1 %v2617_v62 }
 0x17e   :  { %1778 = vmatprep.subr.bf16.mxu0 %v2602_v46  ;;  %1810 = vmatprep.subr.bf16.mxu1 %v2620_v1 }
 0x181   :  { %1780 = vmatpush1.bf16.msra.mxu0 %v2611_v55  ;;  %1812 = vmatpush1.bf16.msra.mxu1 %v2629_v15 }
 0x182   :  { %1782 = vmatprep.subr.bf16.mxu0 %v2614_v58  ;;  %1814 = vmatprep.subr.bf16.mxu1 %v2632_v18 }
 0x185   :  { %1784 = vmatpush1.bf16.msra.mxu0 %v2623_v7  ;;  %1816 = vmatpush1.bf16.msra.mxu1 %v2641_v31 }
 0x186   :  { %1786 = vmatprep.subr.bf16.mxu0 %v2626_v10  ;;  %1818 = vmatprep.subr.bf16.mxu1 %v2644_v32 }
 0x189   :  { %1788 = vmatpush1.bf16.msra.mxu0 %v2635_v24  ;;  %1820 = vmatpush1.bf16.msra.mxu1 %v2651_v40 }
 0x18a   :  { %1790 = vmatprep.subr.bf16.mxu0 %v2638_v27  ;;  %1822 = vmatprep.subr.bf16.mxu1 %v2654_v41 }
 0x18d   :  { %1792 = vmatpush1.bf16.msra.mxu0 %v2647_v39  ;;  %1824 = vmatpush1.bf16.msra.mxu1 %v2658_v49 }
 0x18e   :  { %1826 = vmatprep.subr.bf16.mxu0 %v2566_v4  ;;  %1858 = vmatprep.subr.bf16.mxu1 %v2579_v22 }
 0x243   :  { %v393_v53 = vpop.f32.mrb[2].mxu0  ;;  %v464_v54 = vpop.f32.mrb[2].mxu1 }
 0x244   :  { %v469_v56 = vadd.f32 %v393_v53, %v323_v50  ;;  %v395_v57 = vpop.f32.mrb[3].mxu0  ;;  %v466_v59 = vpop.f32.mrb[3].mxu1  ;;  %v471_v11 = vadd.f32 %v464_v54, %v325_v5  ;;  %v501_v50 = vld [vmem:[#allocation2 + $0x48] sm:$0xff] }
 0x245   :  { %v470_v60 = vadd.f32 %v395_v57, %v324_v51  ;;  %v472_v3 = vadd.f32 %v466_v59, %v326_v2 }
 0x246   :  { %v1612_v61 = vmul.f32 -1.442695, %v469_v56 }
 0x247   :  { %v1613_v63 = vmul.f32 -1.442695, %v470_v60  ;;  %v1614_v6 = vmul.f32 -1.442695, %v472_v3  ;;  %v502_v3 = vld [vmem:[#allocation2 + $0x50] sm:$0xff] }
 0x248   :  { %2173 = vpow2.f32 %v1612_v61 }
 0x249   :  { %2175 = vpow2.f32 %v1613_v63  ;;  %v503_v63 = vld [vmem:[#allocation2 + $0x58] sm:$0xff] }
 0x24a   :  { %2177 = vpow2.f32 %v1614_v6 }
 0x24b   :  { %2179 = vtanh.f32 %v471_v11 }
 0x252   :  { %v2174_v12 = vpop.eup %2173 }
 0x253   :  { %v2176_v13 = vpop.eup %2175  ;;  %v476_v16 = vadd.f32 1.0, %v2174_v12 }
 0x254   :  { %v482_v19 = vadd.f32 1.0, %v2176_v13  ;;  %v2178_v20 = vpop.eup %2177 }
 0x255   :  { %2181 = vrcp.f32 %v476_v16  ;;  %v2180_v21 = vpop.eup %2179  ;;  %v489_v34 = vadd.f32 1.0, %v2178_v20 }
 0x256   :  { %2183 = vrcp.f32 %v482_v19 }
 0x257   :  { %2185 = vrcp.f32 %v489_v34 }
 0x25f   :  { %v2182_v23 = vpop.eup %2181 }
 0x260   :  { %v2184_v28 = vpop.eup %2183  ;;  %v493_v29 = vmul.f32 %v2182_v23, %v2180_v21 }
 0x261   :  { %v492_v35 = vmul.f32 %v2184_v28, %v2698_v38  ;;  %v2186_v43 = vpop.eup %2185  ;;  %v500_v38 = vld [vmem:[#allocation2 + $0x40] sm:$0xff] }
 0x263   :  { %v2736_v36 = vadd.f32 %v493_v29, %v492_v35 }
 0x265   :  { %2187 = vtanh.f32 %v2736_v36 }
 0x26f   :  { %v2188_v44 = vpop.eup %2187 }
 0x270   :  { %v496_v47 = vmul.f32 %v2188_v44, %v2186_v43 }
 0x272   :  { %498 = vst [vmem:[#allocation10 + $0x8] sm:$0xff] %v496_v47  ;;  %569 = vmatmul.mubr.f32.vlgmr.msra.gmra.mrb[4].mxu0 %v496_v47  ;;  %640 = vmatmul.mubr.f32.vlgmr.msra.gmra.mrb[4].mxu1 %v496_v47 }
 0x273   :  { %1828 = vmatpush1.bf16.msra.mxu0 %v2568_v8  ;;  %1860 = vmatpush1.bf16.msra.mxu1 %v2581_v25 }
 0x274   :  { %1830 = vmatprep.subr.bf16.mxu0 %v2570_v9  ;;  %1862 = vmatprep.subr.bf16.mxu1 %v2591_v33 }
 0x275   :  { %745 = vmatprep.mubr.f32.mxu0 %v2455_v0  ;;  %816 = vmatprep.mubr.f32.mxu1 %v2455_v0 }
 0x277   :  { %1832 = vmatpush1.bf16.msra.mxu0 %v2574_v14  ;;  %1864 = vmatpush1.bf16.msra.mxu1 %v2593_v37 }
 0x278   :  { %1834 = vmatprep.subr.bf16.mxu0 %v2577_v17  ;;  %1866 = vmatprep.subr.bf16.mxu1 %v2599_v45 }
 0x27b   :  { %1836 = vmatpush1.bf16.msra.mxu0 %v2584_v26  ;;  %1868 = vmatpush1.bf16.msra.mxu1 %v2605_v48 }
 0x27c   :  { %1838 = vmatprep.subr.bf16.mxu0 %v2588_v30  ;;  %1870 = vmatprep.subr.bf16.mxu1 %v2608_v52 }
 0x27f   :  { %1840 = vmatpush1.bf16.msra.mxu0 %v2597_v42  ;;  %1872 = vmatpush1.bf16.msra.mxu1 %v2617_v62 }
 0x280   :  { %1842 = vmatprep.subr.bf16.mxu0 %v2602_v46  ;;  %1874 = vmatprep.subr.bf16.mxu1 %v2620_v1 }
 0x283   :  { %1844 = vmatpush1.bf16.msra.mxu0 %v2611_v55  ;;  %1876 = vmatpush1.bf16.msra.mxu1 %v2629_v15 }
 0x284   :  { %1846 = vmatprep.subr.bf16.mxu0 %v2614_v58  ;;  %1878 = vmatprep.subr.bf16.mxu1 %v2632_v18 }
 0x287   :  { %1848 = vmatpush1.bf16.msra.mxu0 %v2623_v7  ;;  %1880 = vmatpush1.bf16.msra.mxu1 %v2641_v31 }
 0x288   :  { %1850 = vmatprep.subr.bf16.mxu0 %v2626_v10  ;;  %1882 = vmatprep.subr.bf16.mxu1 %v2644_v32 }
 0x28b   :  { %1852 = vmatpush1.bf16.msra.mxu0 %v2635_v24  ;;  %1884 = vmatpush1.bf16.msra.mxu1 %v2651_v40 }
 0x28c   :  { %1854 = vmatprep.subr.bf16.mxu0 %v2638_v27  ;;  %1886 = vmatprep.subr.bf16.mxu1 %v2654_v41 }
 0x28f   :  { %1856 = vmatpush1.bf16.msra.mxu0 %v2647_v39  ;;  %1888 = vmatpush1.bf16.msra.mxu1 %v2658_v49 }
 0x290   :  { %1890 = vmatprep.subr.bf16.mxu0 %v2566_v4  ;;  %1922 = vmatprep.subr.bf16.mxu1 %v2579_v22 }
 0x345   :  { %v570_v51 = vpop.f32.mrb[4].mxu0  ;;  %v641_v53 = vpop.f32.mrb[4].mxu1 }
 0x346   :  { %v646_v54 = vadd.f32 %v570_v51, %v500_v38  ;;  %v572_v56 = vpop.f32.mrb[5].mxu0  ;;  %v643_v57 = vpop.f32.mrb[5].mxu1  ;;  %v648_v6 = vadd.f32 %v641_v53, %v502_v3  ;;  %v678_v38 = vld [vmem:[#allocation2 + $0x68] sm:$0xff] }
 0x347   :  { %v647_v59 = vadd.f32 %v572_v56, %v501_v50  ;;  %v649_v2 = vadd.f32 %v643_v57, %v503_v63 }
 0x348   :  { %v1615_v60 = vmul.f32 -1.442695, %v646_v54 }
 0x349   :  { %v1616_v61 = vmul.f32 -1.442695, %v647_v59  ;;  %v1617_v5 = vmul.f32 -1.442695, %v649_v2  ;;  %v679_v2 = vld [vmem:[#allocation2 + $0x70] sm:$0xff] }
 0x34a   :  { %2189 = vpow2.f32 %v1615_v60 }
 0x34b   :  { %2191 = vpow2.f32 %v1616_v61  ;;  %v680_v61 = vld [vmem:[#allocation2 + $0x78] sm:$0xff] }
 0x34c   :  { %2193 = vpow2.f32 %v1617_v5 }
 0x34d   :  { %2195 = vtanh.f32 %v648_v6 }
 0x354   :  { %v2190_v11 = vpop.eup %2189 }
 0x355   :  { %v2192_v12 = vpop.eup %2191  ;;  %v653_v13 = vadd.f32 1.0, %v2190_v11 }
 0x356   :  { %v659_v16 = vadd.f32 1.0, %v2192_v12  ;;  %v2194_v19 = vpop.eup %2193 }
 0x357   :  { %2197 = vrcp.f32 %v653_v13  ;;  %v2196_v20 = vpop.eup %2195  ;;  %v666_v29 = vadd.f32 1.0, %v2194_v19 }
 0x358   :  { %2199 = vrcp.f32 %v659_v16 }
 0x359   :  { %2201 = vrcp.f32 %v666_v29 }
 0x361   :  { %v2198_v21 = vpop.eup %2197 }
 0x362   :  { %v2200_v23 = vpop.eup %2199  ;;  %v670_v28 = vmul.f32 %v2198_v21, %v2196_v20 }
 0x363   :  { %v669_v34 = vmul.f32 %v2200_v23, %v2736_v36  ;;  %v2202_v43 = vpop.eup %2201  ;;  %v677_v36 = vld [vmem:[#allocation2 + $0x60] sm:$0xff] }
 0x365   :  { %v2774_v35 = vadd.f32 %v670_v28, %v669_v34 }
 0x367   :  { %2203 = vtanh.f32 %v2774_v35 }
 0x371   :  { %v2204_v44 = vpop.eup %2203 }
 0x372   :  { %v673_v47 = vmul.f32 %v2204_v44, %v2202_v43 }
 0x374   :  { %675 = vst [vmem:[#allocation10 + $0x10] sm:$0xff] %v673_v47  ;;  %746 = vmatmul.mubr.f32.vlgmr.msra.gmra.mrb[6].mxu0 %v673_v47  ;;  %817 = vmatmul.mubr.f32.vlgmr.msra.gmra.mrb[6].mxu1 %v673_v47 }
 0x375   :  { %1892 = vmatpush1.bf16.msra.mxu0 %v2568_v8  ;;  %1924 = vmatpush1.bf16.msra.mxu1 %v2581_v25 }
 0x376   :  { %1894 = vmatprep.subr.bf16.mxu0 %v2570_v9  ;;  %1926 = vmatprep.subr.bf16.mxu1 %v2591_v33 }
 0x377   :  { %922 = vmatprep.mubr.f32.mxu0 %v2455_v0  ;;  %993 = vmatprep.mubr.f32.mxu1 %v2455_v0 }
 0x379   :  { %1896 = vmatpush1.bf16.msra.mxu0 %v2574_v14  ;;  %1928 = vmatpush1.bf16.msra.mxu1 %v2593_v37 }
 0x37a   :  { %1898 = vmatprep.subr.bf16.mxu0 %v2577_v17  ;;  %1930 = vmatprep.subr.bf16.mxu1 %v2599_v45 }
 0x37d   :  { %1900 = vmatpush1.bf16.msra.mxu0 %v2584_v26  ;;  %1932 = vmatpush1.bf16.msra.mxu1 %v2605_v48 }
 0x37e   :  { %1902 = vmatprep.subr.bf16.mxu0 %v2588_v30  ;;  %1934 = vmatprep.subr.bf16.mxu1 %v2608_v52 }
 0x381   :  { %1904 = vmatpush1.bf16.msra.mxu0 %v2597_v42  ;;  %1936 = vmatpush1.bf16.msra.mxu1 %v2617_v62 }
 0x382   :  { %1906 = vmatprep.subr.bf16.mxu0 %v2602_v46  ;;  %1938 = vmatprep.subr.bf16.mxu1 %v2620_v1 }
 0x385   :  { %1908 = vmatpush1.bf16.msra.mxu0 %v2611_v55  ;;  %1940 = vmatpush1.bf16.msra.mxu1 %v2629_v15 }
 0x386   :  { %1910 = vmatprep.subr.bf16.mxu0 %v2614_v58  ;;  %1942 = vmatprep.subr.bf16.mxu1 %v2632_v18 }
 0x389   :  { %1912 = vmatpush1.bf16.msra.mxu0 %v2623_v7  ;;  %1944 = vmatpush1.bf16.msra.mxu1 %v2641_v31 }
 0x38a   :  { %1914 = vmatprep.subr.bf16.mxu0 %v2626_v10  ;;  %1946 = vmatprep.subr.bf16.mxu1 %v2644_v32 }
 0x38d   :  { %1916 = vmatpush1.bf16.msra.mxu0 %v2635_v24  ;;  %1948 = vmatpush1.bf16.msra.mxu1 %v2651_v40 }
 0x38e   :  { %1918 = vmatprep.subr.bf16.mxu0 %v2638_v27  ;;  %1950 = vmatprep.subr.bf16.mxu1 %v2654_v41 }
 0x391   :  { %1920 = vmatpush1.bf16.msra.mxu0 %v2647_v39  ;;  %1952 = vmatpush1.bf16.msra.mxu1 %v2658_v49 }
 0x392   :  { %1954 = vmatprep.subr.bf16.mxu0 %v2566_v4  ;;  %1986 = vmatprep.subr.bf16.mxu1 %v2579_v22 }
 0x447   :  { %v747_v50 = vpop.f32.mrb[6].mxu0  ;;  %v818_v51 = vpop.f32.mrb[6].mxu1 }
 0x448   :  { %v823_v53 = vadd.f32 %v747_v50, %v677_v36  ;;  %v749_v54 = vpop.f32.mrb[7].mxu0  ;;  %v820_v56 = vpop.f32.mrb[7].mxu1  ;;  %v825_v5 = vadd.f32 %v818_v51, %v679_v2  ;;  %v855_v36 = vld [vmem:[#allocation2 + $0x88] sm:$0xff] }
 0x449   :  { %v824_v57 = vadd.f32 %v749_v54, %v678_v38  ;;  %v826_v63 = vadd.f32 %v820_v56, %v680_v61 }
 0x44a   :  { %v1618_v59 = vmul.f32 -1.442695, %v823_v53 }
 0x44b   :  { %v1619_v60 = vmul.f32 -1.442695, %v824_v57  ;;  %v1620_v3 = vmul.f32 -1.442695, %v826_v63  ;;  %v856_v63 = vld [vmem:[#allocation2 + $0x90] sm:$0xff] }
 0x44c   :  { %2205 = vpow2.f32 %v1618_v59 }
 0x44d   :  { %2207 = vpow2.f32 %v1619_v60  ;;  %v857_v60 = vld [vmem:[#allocation2 + $0x98] sm:$0xff] }
 0x44e   :  { %2209 = vpow2.f32 %v1620_v3 }
 0x44f   :  { %2211 = vtanh.f32 %v825_v5 }
 0x456   :  { %v2206_v6 = vpop.eup %2205 }
 0x457   :  { %v2208_v11 = vpop.eup %2207  ;;  %v830_v12 = vadd.f32 1.0, %v2206_v6 }
 0x458   :  { %v836_v13 = vadd.f32 1.0, %v2208_v11  ;;  %v2210_v16 = vpop.eup %2209 }
 0x459   :  { %2213 = vrcp.f32 %v830_v12  ;;  %v2212_v19 = vpop.eup %2211  ;;  %v843_v28 = vadd.f32 1.0, %v2210_v16 }
 0x45a   :  { %2215 = vrcp.f32 %v836_v13 }
 0x45b   :  { %2217 = vrcp.f32 %v843_v28 }
 0x463   :  { %v2214_v20 = vpop.eup %2213 }
 0x464   :  { %v2216_v21 = vpop.eup %2215  ;;  %v847_v23 = vmul.f32 %v2214_v20, %v2212_v19 }
 0x465   :  { %v846_v29 = vmul.f32 %v2216_v21, %v2774_v35  ;;  %v2218_v43 = vpop.eup %2217  ;;  %v854_v35 = vld [vmem:[#allocation2 + $0x80] sm:$0xff] }
 0x467   :  { %v2812_v34 = vadd.f32 %v847_v23, %v846_v29 }
 0x469   :  { %2219 = vtanh.f32 %v2812_v34 }
 0x473   :  { %v2220_v44 = vpop.eup %2219 }
 0x474   :  { %v850_v47 = vmul.f32 %v2220_v44, %v2218_v43 }
 0x476   :  { %852 = vst [vmem:[#allocation10 + $0x18] sm:$0xff] %v850_v47  ;;  %923 = vmatmul.mubr.f32.vlgmr.msra.gmra.mrb[8].mxu0 %v850_v47  ;;  %994 = vmatmul.mubr.f32.vlgmr.msra.gmra.mrb[8].mxu1 %v850_v47 }
 0x477   :  { %1956 = vmatpush1.bf16.msra.mxu0 %v2568_v8  ;;  %1988 = vmatpush1.bf16.msra.mxu1 %v2581_v25 }
 0x478   :  { %1958 = vmatprep.subr.bf16.mxu0 %v2570_v9  ;;  %1990 = vmatprep.subr.bf16.mxu1 %v2591_v33 }
 0x479   :  { %1099 = vmatprep.mubr.f32.mxu0 %v2455_v0  ;;  %1170 = vmatprep.mubr.f32.mxu1 %v2455_v0 }
 0x47b   :  { %1960 = vmatpush1.bf16.msra.mxu0 %v2574_v14  ;;  %1992 = vmatpush1.bf16.msra.mxu1 %v2593_v37 }
 0x47c   :  { %1962 = vmatprep.subr.bf16.mxu0 %v2577_v17  ;;  %1994 = vmatprep.subr.bf16.mxu1 %v2599_v45 }
 0x47f   :  { %1964 = vmatpush1.bf16.msra.mxu0 %v2584_v26  ;;  %1996 = vmatpush1.bf16.msra.mxu1 %v2605_v48 }
 0x480   :  { %1966 = vmatprep.subr.bf16.mxu0 %v2588_v30  ;;  %1998 = vmatprep.subr.bf16.mxu1 %v2608_v52 }
 0x483   :  { %1968 = vmatpush1.bf16.msra.mxu0 %v2597_v42  ;;  %2000 = vmatpush1.bf16.msra.mxu1 %v2617_v62 }
 0x484   :  { %1970 = vmatprep.subr.bf16.mxu0 %v2602_v46  ;;  %2002 = vmatprep.subr.bf16.mxu1 %v2620_v1 }
 0x487   :  { %1972 = vmatpush1.bf16.msra.mxu0 %v2611_v55  ;;  %2004 = vmatpush1.bf16.msra.mxu1 %v2629_v15 }
 0x488   :  { %1974 = vmatprep.subr.bf16.mxu0 %v2614_v58  ;;  %2006 = vmatprep.subr.bf16.mxu1 %v2632_v18 }
 0x48b   :  { %1976 = vmatpush1.bf16.msra.mxu0 %v2623_v7  ;;  %2008 = vmatpush1.bf16.msra.mxu1 %v2641_v31 }
 0x48c   :  { %1978 = vmatprep.subr.bf16.mxu0 %v2626_v10  ;;  %2010 = vmatprep.subr.bf16.mxu1 %v2644_v32 }
 0x48f   :  { %1980 = vmatpush1.bf16.msra.mxu0 %v2635_v24  ;;  %2012 = vmatpush1.bf16.msra.mxu1 %v2651_v40 }
 0x490   :  { %1982 = vmatprep.subr.bf16.mxu0 %v2638_v27  ;;  %2014 = vmatprep.subr.bf16.mxu1 %v2654_v41 }
 0x493   :  { %1984 = vmatpush1.bf16.msra.mxu0 %v2647_v39  ;;  %2016 = vmatpush1.bf16.msra.mxu1 %v2658_v49 }
 0x494   :  { %2018 = vmatprep.subr.bf16.mxu0 %v2566_v4  ;;  %2050 = vmatprep.subr.bf16.mxu1 %v2579_v22 }
 0x549   :  { %v924_v38 = vpop.f32.mrb[8].mxu0  ;;  %v995_v50 = vpop.f32.mrb[8].mxu1 }
 0x54a   :  { %v1000_v51 = vadd.f32 %v924_v38, %v854_v35  ;;  %v926_v53 = vpop.f32.mrb[9].mxu0  ;;  %v997_v54 = vpop.f32.mrb[9].mxu1  ;;  %v1002_v3 = vadd.f32 %v995_v50, %v856_v63  ;;  %v1032_v35 = vld [vmem:[#allocation2 + $0xa8] sm:$0xff] }
 0x54b   :  { %v1001_v56 = vadd.f32 %v926_v53, %v855_v36  ;;  %v1003_v61 = vadd.f32 %v997_v54, %v857_v60 }
 0x54c   :  { %v1621_v57 = vmul.f32 -1.442695, %v1000_v51 }
 0x54d   :  { %v1622_v59 = vmul.f32 -1.442695, %v1001_v56  ;;  %v1623_v2 = vmul.f32 -1.442695, %v1003_v61  ;;  %v1033_v61 = vld [vmem:[#allocation2 + $0xb0] sm:$0xff] }
 0x54e   :  { %2221 = vpow2.f32 %v1621_v57 }
 0x54f   :  { %2223 = vpow2.f32 %v1622_v59  ;;  %v1034_v59 = vld [vmem:[#allocation2 + $0xb8] sm:$0xff] }
 0x550   :  { %2225 = vpow2.f32 %v1623_v2 }
 0x551   :  { %2227 = vtanh.f32 %v1002_v3 }
 0x558   :  { %v2222_v5 = vpop.eup %2221 }
 0x559   :  { %v2224_v6 = vpop.eup %2223  ;;  %v1007_v11 = vadd.f32 1.0, %v2222_v5 }
 0x55a   :  { %v1013_v12 = vadd.f32 1.0, %v2224_v6  ;;  %v2226_v13 = vpop.eup %2225 }
 0x55b   :  { %2229 = vrcp.f32 %v1007_v11  ;;  %v2228_v16 = vpop.eup %2227  ;;  %v1020_v23 = vadd.f32 1.0, %v2226_v13 }
 0x55c   :  { %2231 = vrcp.f32 %v1013_v12 }
 0x55d   :  { %2233 = vrcp.f32 %v1020_v23 }
 0x565   :  { %v2230_v19 = vpop.eup %2229 }
 0x566   :  { %v2232_v20 = vpop.eup %2231  ;;  %v1024_v21 = vmul.f32 %v2230_v19, %v2228_v16 }
 0x567   :  { %v1023_v28 = vmul.f32 %v2232_v20, %v2812_v34  ;;  %v2234_v43 = vpop.eup %2233  ;;  %v1031_v34 = vld [vmem:[#allocation2 + $0xa0] sm:$0xff] }
 0x569   :  { %v2850_v29 = vadd.f32 %v1024_v21, %v1023_v28 }
 0x56b   :  { %2235 = vtanh.f32 %v2850_v29 }
 0x575   :  { %v2236_v44 = vpop.eup %2235 }
 0x576   :  { %v1027_v47 = vmul.f32 %v2236_v44, %v2234_v43 }
 0x578   :  { %1029 = vst [vmem:[#allocation10 + $0x20] sm:$0xff] %v1027_v47  ;;  %1100 = vmatmul.mubr.f32.vlgmr.msra.gmra.mrb[10].mxu0 %v1027_v47  ;;  %1171 = vmatmul.mubr.f32.vlgmr.msra.gmra.mrb[10].mxu1 %v1027_v47 }
 0x579   :  { %2020 = vmatpush1.bf16.msra.mxu0 %v2568_v8  ;;  %2052 = vmatpush1.bf16.msra.mxu1 %v2581_v25 }
 0x57a   :  { %2022 = vmatprep.subr.bf16.mxu0 %v2570_v9  ;;  %2054 = vmatprep.subr.bf16.mxu1 %v2591_v33 }
 0x57b   :  { %1276 = vmatprep.mubr.f32.mxu0 %v2455_v0  ;;  %1347 = vmatprep.mubr.f32.mxu1 %v2455_v0 }
 0x57d   :  { %2024 = vmatpush1.bf16.msra.mxu0 %v2574_v14  ;;  %2056 = vmatpush1.bf16.msra.mxu1 %v2593_v37 }
 0x57e   :  { %2026 = vmatprep.subr.bf16.mxu0 %v2577_v17  ;;  %2058 = vmatprep.subr.bf16.mxu1 %v2599_v45 }
 0x581   :  { %2028 = vmatpush1.bf16.msra.mxu0 %v2584_v26  ;;  %2060 = vmatpush1.bf16.msra.mxu1 %v2605_v48 }
 0x582   :  { %2030 = vmatprep.subr.bf16.mxu0 %v2588_v30  ;;  %2062 = vmatprep.subr.bf16.mxu1 %v2608_v52 }
 0x585   :  { %2032 = vmatpush1.bf16.msra.mxu0 %v2597_v42  ;;  %2064 = vmatpush1.bf16.msra.mxu1 %v2617_v62 }
 0x586   :  { %2034 = vmatprep.subr.bf16.mxu0 %v2602_v46  ;;  %2066 = vmatprep.subr.bf16.mxu1 %v2620_v1 }
 0x589   :  { %2036 = vmatpush1.bf16.msra.mxu0 %v2611_v55  ;;  %2068 = vmatpush1.bf16.msra.mxu1 %v2629_v15 }
 0x58a   :  { %2038 = vmatprep.subr.bf16.mxu0 %v2614_v58  ;;  %2070 = vmatprep.subr.bf16.mxu1 %v2632_v18 }
 0x58d   :  { %2040 = vmatpush1.bf16.msra.mxu0 %v2623_v7  ;;  %2072 = vmatpush1.bf16.msra.mxu1 %v2641_v31 }
 0x58e   :  { %2042 = vmatprep.subr.bf16.mxu0 %v2626_v10  ;;  %2074 = vmatprep.subr.bf16.mxu1 %v2644_v32 }
 0x591   :  { %2044 = vmatpush1.bf16.msra.mxu0 %v2635_v24  ;;  %2076 = vmatpush1.bf16.msra.mxu1 %v2651_v40 }
 0x592   :  { %2046 = vmatprep.subr.bf16.mxu0 %v2638_v27  ;;  %2078 = vmatprep.subr.bf16.mxu1 %v2654_v41 }
 0x595   :  { %2048 = vmatpush1.bf16.msra.mxu0 %v2647_v39  ;;  %2080 = vmatpush1.bf16.msra.mxu1 %v2658_v49 }
 0x596   :  { %2082 = vmatprep.subr.bf16.mxu0 %v2566_v4  ;;  %2114 = vmatprep.subr.bf16.mxu1 %v2579_v22 }
 0x64b   :  { %v1101_v36 = vpop.f32.mrb[10].mxu0  ;;  %v1172_v38 = vpop.f32.mrb[10].mxu1 }
 0x64c   :  { %v1177_v50 = vadd.f32 %v1101_v36, %v1031_v34  ;;  %v1103_v51 = vpop.f32.mrb[11].mxu0  ;;  %v1174_v53 = vpop.f32.mrb[11].mxu1  ;;  %v1179_v2 = vadd.f32 %v1172_v38, %v1033_v61 }
 0x64d   :  { %v1178_v54 = vadd.f32 %v1103_v51, %v1032_v35  ;;  %v1180_v60 = vadd.f32 %v1174_v53, %v1034_v59  ;;  %v1388_v53 = vld [vmem:[#allocation2 + $0xf8] sm:$0xff] }
 0x64e   :  { %v1624_v56 = vmul.f32 -1.442695, %v1177_v50 }
 0x64f   :  { %v1625_v57 = vmul.f32 -1.442695, %v1178_v54  ;;  %v1626_v63 = vmul.f32 -1.442695, %v1180_v60 }
 0x650   :  { %2237 = vpow2.f32 %v1624_v56  ;;  %v1387_v56 = vld [vmem:[#allocation2 + $0xf0] sm:$0xff] }
 0x651   :  { %2239 = vpow2.f32 %v1625_v57 }
 0x652   :  { %2241 = vpow2.f32 %v1626_v63 }
 0x653   :  { %2243 = vtanh.f32 %v1179_v2 }
 0x65a   :  { %v2238_v4 = vpop.eup %2237 }
 0x65b   :  { %v2240_v3 = vpop.eup %2239  ;;  %v1184_v22 = vadd.f32 1.0, %v2238_v4 }
 0x65c   :  { %v1190_v5 = vadd.f32 1.0, %v2240_v3  ;;  %v2242_v6 = vpop.eup %2241 }
 0x65d   :  { %2245 = vrcp.f32 %v1184_v22  ;;  %v2244_v11 = vpop.eup %2243  ;;  %v1197_v19 = vadd.f32 1.0, %v2242_v6 }
 0x65e   :  { %2247 = vrcp.f32 %v1190_v5 }
 0x65f   :  { %2249 = vrcp.f32 %v1197_v19 }
 0x667   :  { %v2246_v12 = vpop.eup %2245 }
 0x668   :  { %v2248_v13 = vpop.eup %2247  ;;  %v1201_v16 = vmul.f32 %v2246_v12, %v2244_v11 }
 0x669   :  { %v1200_v20 = vmul.f32 %v2248_v13, %v2850_v29  ;;  %v2250_v23 = vpop.eup %2249  ;;  %v1386_v29 = vld [vmem:[#allocation2 + $0xe8] sm:$0xff] }
 0x66b   :  { %v2888_v21 = vadd.f32 %v1201_v16, %v1200_v20 }
 0x66d   :  { %2251 = vtanh.f32 %v2888_v21 }
 0x677   :  { %v2252_v28 = vpop.eup %2251 }
 0x678   :  { %v1204_v43 = vmul.f32 %v2252_v28, %v2250_v23 }
 0x67a   :  { %1206 = vst [vmem:[#allocation10 + $0x28] sm:$0xff] %v1204_v43  ;;  %1277 = vmatmul.mubr.f32.vlgmr.msra.gmra.mrb[12].mxu0 %v1204_v43  ;;  %1348 = vmatmul.mubr.f32.vlgmr.msra.gmra.mrb[12].mxu1 %v1204_v43 }
 0x67b   :  { %2084 = vmatpush1.bf16.msra.mxu0 %v2568_v8  ;;  %2116 = vmatpush1.bf16.msra.mxu1 %v2581_v25  ;;  %v1209_v8 = vld [vmem:[#allocation2 + $0xc8] sm:$0xff] }
 0x67c   :  { %2086 = vmatprep.subr.bf16.mxu0 %v2570_v9  ;;  %2118 = vmatprep.subr.bf16.mxu1 %v2591_v33 }
 0x67d   :  { %1453 = vmatprep.mubr.f32.mxu0 %v2455_v0  ;;  %1524 = vmatprep.mubr.f32.mxu1 %v2455_v0  ;;  %v1208_v0 = vld [vmem:[#allocation2 + $0xc0] sm:$0xff] }
 0x67f   :  { %2088 = vmatpush1.bf16.msra.mxu0 %v2574_v14  ;;  %2120 = vmatpush1.bf16.msra.mxu1 %v2593_v37 }
 0x680   :  { %2090 = vmatprep.subr.bf16.mxu0 %v2577_v17  ;;  %2122 = vmatprep.subr.bf16.mxu1 %v2599_v45 }
 0x683   :  { %2092 = vmatpush1.bf16.msra.mxu0 %v2584_v26  ;;  %2124 = vmatpush1.bf16.msra.mxu1 %v2605_v48 }
 0x684   :  { %2094 = vmatprep.subr.bf16.mxu0 %v2588_v30  ;;  %2126 = vmatprep.subr.bf16.mxu1 %v2608_v52 }
 0x687   :  { %2096 = vmatpush1.bf16.msra.mxu0 %v2597_v42  ;;  %2128 = vmatpush1.bf16.msra.mxu1 %v2617_v62  ;;  %v1211_v42 = vld [vmem:[#allocation2 + $0xd8] sm:$0xff] }
 0x688   :  { %2098 = vmatprep.subr.bf16.mxu0 %v2602_v46  ;;  %2130 = vmatprep.subr.bf16.mxu1 %v2620_v1  ;;  %v1210_v46 = vld [vmem:[#allocation2 + $0xd0] sm:$0xff] }
 0x68b   :  { %2100 = vmatpush1.bf16.msra.mxu0 %v2611_v55  ;;  %2132 = vmatpush1.bf16.msra.mxu1 %v2629_v15 }
 0x68c   :  { %2102 = vmatprep.subr.bf16.mxu0 %v2614_v58  ;;  %2134 = vmatprep.subr.bf16.mxu1 %v2632_v18 }
 0x68f   :  { %2104 = vmatpush1.bf16.msra.mxu0 %v2623_v7  ;;  %2136 = vmatpush1.bf16.msra.mxu1 %v2641_v31 }
 0x690   :  { %2106 = vmatprep.subr.bf16.mxu0 %v2626_v10  ;;  %2138 = vmatprep.subr.bf16.mxu1 %v2644_v32 }
 0x693   :  { %2108 = vmatpush1.bf16.msra.mxu0 %v2635_v24  ;;  %2140 = vmatpush1.bf16.msra.mxu1 %v2651_v40 }
 0x694   :  { %2110 = vmatprep.subr.bf16.mxu0 %v2638_v27  ;;  %2142 = vmatprep.subr.bf16.mxu1 %v2654_v41 }
 0x697   :  { %2112 = vmatpush1.bf16.msra.mxu0 %v2647_v39  ;;  %2144 = vmatpush1.bf16.msra.mxu1 %v2658_v49  ;;  %v1385_v49 = vld [vmem:[#allocation2 + $0xe0] sm:$0xff] }
 0x74d   :  { %v1278_v9 = vpop.f32.mrb[12].mxu0  ;;  %v1349_v14 = vpop.f32.mrb[12].mxu1 }
 0x74e   :  { %v1354_v17 = vadd.f32 %v1278_v9, %v1208_v0  ;;  %v1280_v25 = vpop.f32.mrb[13].mxu0  ;;  %v1351_v26 = vpop.f32.mrb[13].mxu1  ;;  %v1356_v52 = vadd.f32 %v1349_v14, %v1210_v46 }
 0x74f   :  { %v1355_v30 = vadd.f32 %v1280_v25, %v1209_v8  ;;  %v1357_v45 = vadd.f32 %v1351_v26, %v1211_v42 }
 0x750   :  { %v1627_v33 = vmul.f32 -1.442695, %v1354_v17 }
 0x751   :  { %v1628_v37 = vmul.f32 -1.442695, %v1355_v30  ;;  %v1629_v48 = vmul.f32 -1.442695, %v1357_v45 }
 0x752   :  { %2253 = vpow2.f32 %v1627_v33 }
 0x753   :  { %2255 = vpow2.f32 %v1628_v37 }
 0x754   :  { %2257 = vpow2.f32 %v1629_v48 }
 0x755   :  { %2259 = vtanh.f32 %v1356_v52 }
 0x75c   :  { %v2254_v55 = vpop.eup %2253 }
 0x75d   :  { %v2256_v58 = vpop.eup %2255  ;;  %v1361_v62 = vadd.f32 1.0, %v2254_v55 }
 0x75e   :  { %v1367_v1 = vadd.f32 1.0, %v2256_v58  ;;  %v2258_v7 = vpop.eup %2257 }
 0x75f   :  { %2261 = vrcp.f32 %v1361_v62  ;;  %v2260_v10 = vpop.eup %2259  ;;  %v1374_v27 = vadd.f32 1.0, %v2258_v7 }
 0x760   :  { %2263 = vrcp.f32 %v1367_v1 }
 0x761   :  { %2265 = vrcp.f32 %v1374_v27 }
 0x769   :  { %v2262_v15 = vpop.eup %2261 }
 0x76a   :  { %v2264_v18 = vpop.eup %2263  ;;  %v1378_v24 = vmul.f32 %v2262_v15, %v2260_v10 }
 0x76b   :  { %v1377_v31 = vmul.f32 %v2264_v18, %v2888_v21  ;;  %v2266_v39 = vpop.eup %2265 }
 0x76d   :  { %v1379_v32 = vadd.f32 %v1378_v24, %v1377_v31 }
 0x76f   :  { %2267 = vtanh.f32 %v1379_v32 }
 0x779   :  { %v2268_v40 = vpop.eup %2267 }
 0x77a   :  { %v1381_v41 = vmul.f32 %v2268_v40, %v2266_v39 }
 0x77c   :  { %1383 = vst [vmem:[#allocation10 + $0x30] sm:$0xff] %v1381_v41  ;;  %1454 = vmatmul.mubr.f32.vlgmr.msra.gmra.mrb[14].mxu0 %v1381_v41  ;;  %1525 = vmatmul.mubr.f32.vlgmr.msra.gmra.mrb[14].mxu1 %v1381_v41 }
 0x84f   :  { %v1455_v44 = vpop.f32.mrb[14].mxu0  ;;  %v1526_v47 = vpop.f32.mrb[14].mxu1 }
 0x850   :  { %v1531_v34 = vadd.f32 %v1455_v44, %v1385_v49  ;;  %v1457_v35 = vpop.f32.mrb[15].mxu0  ;;  %v1528_v36 = vpop.f32.mrb[15].mxu1  ;;  %v1533_v59 = vadd.f32 %v1526_v47, %v1387_v56 }
 0x851   :  { %v1532_v38 = vadd.f32 %v1457_v35, %v1386_v29  ;;  %v1534_v54 = vadd.f32 %v1528_v36, %v1388_v53 }
 0x852   :  { %v1630_v50 = vmul.f32 -1.442695, %v1531_v34 }
 0x853   :  { %v1631_v51 = vmul.f32 -1.442695, %v1532_v38  ;;  %v1632_v57 = vmul.f32 -1.442695, %v1534_v54 }
 0x854   :  { %2269 = vpow2.f32 %v1630_v50 }
 0x855   :  { %2271 = vpow2.f32 %v1631_v51 }
 0x856   :  { %2273 = vpow2.f32 %v1632_v57 }
 0x857   :  { %2275 = vtanh.f32 %v1533_v59 }
 0x85e   :  { %v2270_v60 = vpop.eup %2269 }
 0x85f   :  { %v2272_v61 = vpop.eup %2271  ;;  %v1538_v63 = vadd.f32 1.0, %v2270_v60 }
 0x860   :  { %v1544_v2 = vadd.f32 1.0, %v2272_v61  ;;  %v2274_v4 = vpop.eup %2273 }
 0x861   :  { %2277 = vrcp.f32 %v1538_v63  ;;  %v2276_v3 = vpop.eup %2275  ;;  %v1551_v11 = vadd.f32 1.0, %v2274_v4 }
 0x862   :  { %2279 = vrcp.f32 %v1544_v2 }
 0x863   :  { %2281 = vrcp.f32 %v1551_v11 }
 0x86b   :  { %v2278_v22 = vpop.eup %2277 }
 0x86c   :  { %v2280_v5 = vpop.eup %2279  ;;  %v1555_v6 = vmul.f32 %v2278_v22, %v2276_v3 }
 0x86d   :  { %v1554_v12 = vmul.f32 %v2280_v5, %v1379_v32  ;;  %v2282_v16 = vpop.eup %2281 }
 0x86f   :  { %v1556_v13 = vadd.f32 %v1555_v6, %v1554_v12 }
 0x871   :  { %2283 = vtanh.f32 %v1556_v13  ;;  %1562 = vst [vmem:[#allocation13] sm:$0xff] %v1556_v13 }
 0x87b   :  { %v2284_v19 = vpop.eup %2283 }
 0x87c   :  { %v1558_v20 = vmul.f32 %v2284_v19, %v2282_v16 }
 0x87e   :  { %1560 = vst [vmem:[#allocation10 + $0x38] sm:$0xff] %v1558_v20  ;;  %1561 = vst [vmem:[#allocation11] sm:$0xff] %v1558_v20 }
 0x87f   :  { %2384 = shalt.err (!%p2381_p8)
}
 0x880   :  { %s2385_s28 = scalar_lea.hbm %s2979_s5, 128 }
 0x881   :  { %p2386_p9 = scmp.ne.s32.totalorder %s2979_s5, %s2385_s28  ;;  %p2389_p10 = scmp.lt.u32.totalorder %s2385_s28, %s2979_s5 }
 0x883   :  { %p2391_p11 = pnand %p2389_p10, %p2386_p9 }
 0x885   :  { %2394 = shalt.err (!%p2391_p11)
}
 0x886   :  { %1584 = dma.vmem_to_hbm [thread:$0]  %s1582_s1, 128, %s2979_s5, [#allocation12]  }
 0x887   :  { %s2395_s24 = scalar_lea.vmem %s2924_s21, 1024  ;;  %p2400_p13 = scmp.lt.s32.totalorder %s2924_s21, %s2924_s21 }
 0x888   :  { %p2396_p12 = scmp.ne.s32.totalorder %s2924_s21, %s2395_s24  ;;  %p2401_p0 = scmp.lt.s32.totalorder %s2395_s24, %s2395_s24 }
 0x88a   :  { %p2402_p1 = por %p2401_p0, %p2400_p13 }
 0x88c   :  { %p2403_p2 = pnand %p2402_p1, %p2396_p12 }
 0x88e   :  { %2406 = shalt.err (!%p2403_p2)
}
 0x88f   :  { %s2407_s12 = scalar_lea.hbm %s2978_s4, 1024 }
 0x890   :  { %p2408_p3 = scmp.ne.s32.totalorder %s2978_s4, %s2407_s12  ;;  %p2411_p4 = scmp.lt.u32.totalorder %s2407_s12, %s2978_s4 }
 0x892   :  { %p2413_p5 = pnand %p2411_p4, %p2408_p3 }
 0x894   :  { %2416 = shalt.err (!%p2413_p5)
}
 0x895   :  { %s2459_s5 = smov 128   ;;  %s2460_s17 = smov 8  }
 0x896   :  { %1574 = dma.vmem_to_hbm [thread:$0]  %s2924_s21, 1024, %s2978_s4, [#allocation4], %s2459_s5, %s2459_s5, %s2460_s17  }
 0x897   :  { %s2417_s20 = scalar_lea.vmem %s2926_s23, 128  ;;  %p2422_p7 = scmp.lt.s32.totalorder %s2926_s23, %s2926_s23 }
 0x898   :  { %p2418_p6 = scmp.ne.s32.totalorder %s2926_s23, %s2417_s20  ;;  %p2423_p8 = scmp.lt.s32.totalorder %s2417_s20, %s2417_s20 }
 0x89a   :  { %p2424_p9 = por %p2423_p8, %p2422_p7 }
 0x89c   :  { %p2425_p10 = pnand %p2424_p9, %p2418_p6 }
 0x89e   :  { %2428 = shalt.err (!%p2425_p10)
}
 0x89f   :  { %s2429_s19 = scalar_lea.hbm %s2980_s6, 128 }
 0x8a0   :  { %p2430_p11 = scmp.ne.s32.totalorder %s2980_s6, %s2429_s19  ;;  %p2433_p12 = scmp.lt.u32.totalorder %s2429_s19, %s2980_s6 }
 0x8a2   :  { %p2435_p13 = pnand %p2433_p12, %p2430_p11 }
 0x8a4   :  { %2438 = shalt.err (!%p2435_p13)
}
 0x8a5   :  { %1594 = dma.vmem_to_hbm [thread:$0]  %s2926_s23, 128, %s2980_s6, [#allocation12]  }
 0x8a6   :  { %2445 = dma.done.wait [#allocation4], 1024  }
 0x8a7   :  { %2446 = vsyncadd [#allocation4], 4294966272 }
 0x8a8   :  { %2447 = dma.done.wait [#allocation12], 256  }
 0x8a9   :  { %2448 = vsyncadd [#allocation12], 4294967040 }
 0x8aa   :  { %1604 = vsyncpa [#allocation3], 1 }
 0x8ab   :  { %1605 = vsyncpa [#allocation6], 1 }
 0x8ac   :  { %1606 = vsyncpa [#allocation9], 1 }
 0x8ad   :  { %1607 = vsyncpa [#allocation4], 1 }
 0x8ae   :  { %1608 = vsyncpa [#allocation12], 1 }

</bundles_post_ra>
